<compile_context>
chip_gen: v6e
topology: v6e:2x2x1
jax: 0.10.0
libtpu: 0.0.40
codegen_flags: <defaults>
</compile_context>

<pallas_src>
import jax
import jax.numpy as jnp
from jax.experimental import pallas as pl
from jax.experimental.pallas import tpu as pltpu


# --------------------------------------------------------------------------
# Fused Pallas kernel: all LSTM layers (time loop inside) + fc chain
# --------------------------------------------------------------------------
def make_fused_lstm_kernel(num_layers, seq_len, hidden_dim):
    H = hidden_dim

    def kernel(*refs):
        # refs = [x, (w_comb, b) * num_layers, fc1w, fc1b, fc2w, fc2b, fc3w, fc3b, out]
        x_ref = refs[0]                                    # (B, T, Din)  batch-first
        layer_refs = refs[1:1 + 2 * num_layers]            # per layer: (Din_l+H, 4H), (1, 4H)
        fc1w, fc1b, fc2w, fc2b, fc3w, fc3b = refs[1 + 2 * num_layers:-1]
        o_ref = refs[-1]                                    # (B, out_dim)

        B = x_ref.shape[0]
        h = [jnp.zeros((B, H), jnp.float32) for _ in range(num_layers)]
        c = [jnp.zeros((B, H), jnp.float32) for _ in range(num_layers)]

        # Fully-unrolled static time loop; layers interleaved per timestep so the
        # layer-0 sequence is never materialized.
        for t in range(seq_len):
            inp = x_ref[:, t, :].astype(jnp.float32)        # (B, Din) static slice
            for l in range(num_layers):
                w_ref = layer_refs[2 * l]                   # (Din_l + H, 4H) = [W_ih^T; W_hh^T]
                b_ref = layer_refs[2 * l + 1]               # (1, 4H) = b_ih + b_hh
                xh = jnp.concatenate([inp, h[l]], axis=-1)  # (B, Din_l + H): one fused matmul
                gates = (
                    jnp.dot(xh, w_ref[...], preferred_element_type=jnp.float32)
                    + b_ref[...]
                )                                           # (B, 4H); 4H == 128 here -> one vreg row
                # PyTorch gate order: i, f, g, o.  (If H is scaled up, prefer H a
                # multiple of 128 or a gate-major weight layout for free splits.)
                i = jax.nn.sigmoid(gates[:, 0 * H:1 * H])
                f = jax.nn.sigmoid(gates[:, 1 * H:2 * H])
                g = jnp.tanh(gates[:, 2 * H:3 * H])
                o = jax.nn.sigmoid(gates[:, 3 * H:4 * H])
                c[l] = f * c[l] + i * g
                h[l] = o * jnp.tanh(c[l])
                inp = h[l]

        # fc3(fc2(fc1(h_last))) — no nonlinearity between layers (matches the module);
        # applying fc per-timestep then taking [:, -1] equals fc(h at t=T-1).
        y = jnp.dot(h[-1], fc1w[...], preferred_element_type=jnp.float32) + fc1b[...]
        y = jnp.dot(y, fc2w[...], preferred_element_type=jnp.float32) + fc2b[...]
        y = jnp.dot(y, fc3w[...], preferred_element_type=jnp.float32) + fc3b[...]
        o_ref[...] = y.astype(o_ref.dtype)

    return kernel


# --------------------------------------------------------------------------
# Wrapper
# --------------------------------------------------------------------------
def lstm_forward(x, params):
    """x: (B, T, input_dim) -> (B, output_dim). Semantics of LSTM.forward (out[:, -1])."""
    B, T, Din = x.shape
    H = params["hidden_dim"]
    num_layers = len(params["lstm_layers"])
    out_dim = params["fc3_w"].shape[1]

    # Pad batch to a multiple of 8 (f32 sublane count); strip padding rows after.
    B_pad = max(8, ((B + 7) // 8) * 8)
    if B_pad != B:
        x = jnp.pad(x, ((0, B_pad - B), (0, 0), (0, 0)))

    inputs = [x]
    for (w_comb, b) in params["lstm_layers"]:
        inputs += [w_comb, b]
    inputs += [
        params["fc1_w"], params["fc1_b"],
        params["fc2_w"], params["fc2_b"],
        params["fc3_w"], params["fc3_b"],
    ]

    vmem_spec = pl.BlockSpec(memory_space=pltpu.MemorySpace.VMEM)
    out = pl.pallas_call(
        make_fused_lstm_kernel(num_layers, T, H),
        out_shape=jax.ShapeDtypeStruct((B_pad, out_dim), jnp.float32),
        in_specs=[vmem_spec] * len(inputs),
        out_specs=vmem_spec,
    )(*inputs)
    return out[:B]


# --------------------------------------------------------------------------
# Deterministic parameter initialization (synthetic; mirrors the module's shapes)
# --------------------------------------------------------------------------
def xavier_uniform(key, shape):
    fan_out, fan_in = shape
    bound = (6.0 / (fan_in + fan_out)) ** 0.5
    return jax.random.uniform(key, shape, jnp.float32, -bound, bound)


def init_params(key, input_dim, hidden_dim, layer_dim, output_dim):
    # TODO(synk): the PyTorch initialization() has a bug for nn.Linear (uses a stale
    # `param`); here Linear weights/biases use normal(std=0.05) deterministically.
    params = {"hidden_dim": hidden_dim, "lstm_layers": []}
    H = hidden_dim
    for layer in range(layer_dim):
        d_in = input_dim if layer == 0 else hidden_dim
        # W_ih: (4H, d_in), W_hh: (4H, H); each gate chunk xavier-uniform; biases zero.
        chunks_ih, chunks_hh = [], []
        for _ in range(4):
            key, k1, k2 = jax.random.split(key, 3)
            chunks_ih.append(xavier_uniform(k1, (H, d_in)))
            chunks_hh.append(xavier_uniform(k2, (H, H)))
        wih = jnp.concatenate(chunks_ih, axis=0)               # (4H, d_in)
        whh = jnp.concatenate(chunks_hh, axis=0)               # (4H, H)
        w_comb = jnp.concatenate([wih.T, whh.T], axis=0)       # (d_in + H, 4H)  stacked [W_ih^T; W_hh^T]
        b = jnp.zeros((1, 4 * H), jnp.float32)                 # b_ih + b_hh == 0
        params["lstm_layers"].append((w_comb, b))

    def linear(key, d_in, d_out):
        k_w, k_b = jax.random.split(key)
        w = 0.05 * jax.random.normal(k_w, (d_in, d_out), jnp.float32)  # stored as (in, out)
        b = 0.05 * jax.random.normal(k_b, (1, d_out), jnp.float32)
        return w, b

    key, k1, k2, k3 = jax.random.split(key, 4)
    params["fc1_w"], params["fc1_b"] = linear(k1, hidden_dim, 128)
    params["fc2_w"], params["fc2_b"] = linear(k2, 128, 64)
    params["fc3_w"], params["fc3_b"] = linear(k3, 64, output_dim)
    return params


# --------------------------------------------------------------------------
# Pure-JAX reference (for correctness check)
# --------------------------------------------------------------------------
def lstm_forward_ref(x, params):
    B = x.shape[0]
    H = params["hidden_dim"]
    seq = jnp.transpose(x, (1, 0, 2))                          # time-major (T, B, Din)
    for (w_comb, b) in params["lstm_layers"]:
        h0 = jnp.zeros((B, H), jnp.float32)
        c0 = jnp.zeros((B, H), jnp.float32)

        def step(carry, x_t, w_comb=w_comb, b=b):
            h, c = carry
            gates = jnp.concatenate([x_t, h], axis=-1) @ w_comb + b[0]
            i = jax.nn.sigmoid(gates[:, 0 * H:1 * H])
            f = jax.nn.sigmoid(gates[:, 1 * H:2 * H])
            g = jnp.tanh(gates[:, 2 * H:3 * H])
            o = jax.nn.sigmoid(gates[:, 3 * H:4 * H])
            c = f * c + i * g
            h = o * jnp.tanh(c)
            return (h, c), h

        _, seq = jax.lax.scan(step, (h0, c0), seq)
    h_last = seq[-1]
    y = h_last @ params["fc1_w"] + params["fc1_b"][0]
    y = y @ params["fc2_w"] + params["fc2_b"][0]
    y = y @ params["fc3_w"] + params["fc3_b"][0]
    return y


# --------------------------------------------------------------------------
if __name__ == "__main__":
    input_dim, hidden_dim, layer_dim, output_dim = 16, 32, 2, 8
    B, T = 4, 8

    key = jax.random.PRNGKey(0)
    key, kx, kp = jax.random.split(key, 3)
    x = jax.random.normal(kx, (B, T, input_dim), jnp.float32)
    params = init_params(kp, input_dim, hidden_dim, layer_dim, output_dim)

    out = jax.block_until_ready(lstm_forward(x, params))
    ref = jax.block_until_ready(lstm_forward_ref(x, params))

    assert out.shape == (B, output_dim)
    assert jnp.allclose(out, ref, rtol=2e-3, atol=2e-3), "mismatch vs pure-JAX reference"

    print("KERNEL_OK")
</pallas_src>

<mosaic_0001>
module attributes {stable_mosaic.version = 11 : i64} {
  func.func @kernel(%arg0: memref<8x8x16xf32, #tpu.memory_space<vmem>>, %arg1: memref<48x128xf32, #tpu.memory_space<vmem>>, %arg2: memref<1x128xf32, #tpu.memory_space<vmem>>, %arg3: memref<64x128xf32, #tpu.memory_space<vmem>>, %arg4: memref<1x128xf32, #tpu.memory_space<vmem>>, %arg5: memref<32x128xf32, #tpu.memory_space<vmem>>, %arg6: memref<1x128xf32, #tpu.memory_space<vmem>>, %arg7: memref<128x64xf32, #tpu.memory_space<vmem>>, %arg8: memref<1x64xf32, #tpu.memory_space<vmem>>, %arg9: memref<64x8xf32, #tpu.memory_space<vmem>>, %arg10: memref<1x8xf32, #tpu.memory_space<vmem>>, %arg11: memref<8x8xf32, #tpu.memory_space<vmem>>) attributes {dimension_semantics = [], scalar_prefetch = 0 : i64, scratch_operands = 0 : i64, tpu.core_type = #tpu.core_type<tc>} {
    %cst = arith.constant 0.000000e+00 : f32
    %0 = vector.broadcast %cst : f32 to vector<8x32xf32>
    %cst_0 = arith.constant 0.000000e+00 : f32
    %1 = vector.broadcast %cst_0 : f32 to vector<8x32xf32>
    %cst_1 = arith.constant 0.000000e+00 : f32
    %2 = vector.broadcast %cst_1 : f32 to vector<8x32xf32>
    %cst_2 = arith.constant 0.000000e+00 : f32
    %3 = vector.broadcast %cst_2 : f32 to vector<8x32xf32>
    %c0 = arith.constant 0 : index
    %c0_3 = arith.constant 0 : index
    %c0_4 = arith.constant 0 : index
    %4 = vector.load %arg0[%c0, %c0_3, %c0_4] : memref<8x8x16xf32, #tpu.memory_space<vmem>>, vector<8x1x16xf32>
    %5 = vector.shape_cast %4 : vector<8x1x16xf32> to vector<8x16xf32>
    %6 = tpu.concatenate %5, %0 in 1 : vector<8x16xf32>, vector<8x32xf32> -> vector<8x48xf32>
    %c0_5 = arith.constant 0 : index
    %c0_6 = arith.constant 0 : index
    %7 = vector.load %arg1[%c0_5, %c0_6] : memref<48x128xf32, #tpu.memory_space<vmem>>, vector<48x128xf32>
    %cst_7 = arith.constant dense<0.000000e+00> : vector<8x128xf32>
    %8 = tpu.matmul %6, %7, %cst_7 {dimension_numbers = #tpu.dot_dimension_numbers<[1], [0], [0], [1], [0, 0, 1, 1], [], []>} : vector<8x48xf32>, vector<48x128xf32>, vector<8x128xf32> -> vector<8x128xf32>
    %c0_8 = arith.constant 0 : index
    %c0_9 = arith.constant 0 : index
    %9 = vector.load %arg2[%c0_8, %c0_9] : memref<1x128xf32, #tpu.memory_space<vmem>>, vector<1x128xf32>
    %10 = vector.broadcast %9 : vector<1x128xf32> to vector<8x128xf32>
    %11 = arith.addf %8, %10 : vector<8x128xf32>
    %12 = vector.extract_strided_slice %11 {offsets = [0, 0], sizes = [8, 32], strides = [1, 1]} : vector<8x128xf32> to vector<8x32xf32>
    %13 = arith.negf %12 : vector<8x32xf32>
    %14 = math.exp %13 : vector<8x32xf32>
    %cst_10 = arith.constant 1.000000e+00 : f32
    %15 = vector.broadcast %cst_10 : f32 to vector<8x32xf32>
    %16 = arith.addf %15, %14 : vector<8x32xf32>
    %17 = arith.divf %15, %16 : vector<8x32xf32>
    %18 = vector.extract_strided_slice %11 {offsets = [0, 32], sizes = [8, 32], strides = [1, 1]} : vector<8x128xf32> to vector<8x32xf32>
    %19 = arith.negf %18 : vector<8x32xf32>
    %20 = math.exp %19 : vector<8x32xf32>
    %cst_11 = arith.constant 1.000000e+00 : f32
    %21 = vector.broadcast %cst_11 : f32 to vector<8x32xf32>
    %22 = arith.addf %21, %20 : vector<8x32xf32>
    %23 = arith.divf %21, %22 : vector<8x32xf32>
    %24 = vector.extract_strided_slice %11 {offsets = [0, 64], sizes = [8, 32], strides = [1, 1]} : vector<8x128xf32> to vector<8x32xf32>
    %25 = math.tanh %24 : vector<8x32xf32>
    %26 = vector.extract_strided_slice %11 {offsets = [0, 96], sizes = [8, 32], strides = [1, 1]} : vector<8x128xf32> to vector<8x32xf32>
    %27 = arith.negf %26 : vector<8x32xf32>
    %28 = math.exp %27 : vector<8x32xf32>
    %cst_12 = arith.constant 1.000000e+00 : f32
    %29 = vector.broadcast %cst_12 : f32 to vector<8x32xf32>
    %30 = arith.addf %29, %28 : vector<8x32xf32>
    %31 = arith.divf %29, %30 : vector<8x32xf32>
    %32 = arith.mulf %23, %2 : vector<8x32xf32>
    %33 = arith.mulf %17, %25 : vector<8x32xf32>
    %34 = arith.addf %32, %33 : vector<8x32xf32>
    %35 = math.tanh %34 : vector<8x32xf32>
    %36 = arith.mulf %31, %35 : vector<8x32xf32>
    %37 = tpu.concatenate %36, %1 in 1 : vector<8x32xf32>, vector<8x32xf32> -> vector<8x64xf32>
    %c0_13 = arith.constant 0 : index
    %c0_14 = arith.constant 0 : index
    %38 = vector.load %arg3[%c0_13, %c0_14] : memref<64x128xf32, #tpu.memory_space<vmem>>, vector<64x128xf32>
    %cst_15 = arith.constant dense<0.000000e+00> : vector<8x128xf32>
    %39 = tpu.matmul %37, %38, %cst_15 {dimension_numbers = #tpu.dot_dimension_numbers<[1], [0], [0], [1], [0, 0, 1, 1], [], []>} : vector<8x64xf32>, vector<64x128xf32>, vector<8x128xf32> -> vector<8x128xf32>
    %c0_16 = arith.constant 0 : index
    %c0_17 = arith.constant 0 : index
    %40 = vector.load %arg4[%c0_16, %c0_17] : memref<1x128xf32, #tpu.memory_space<vmem>>, vector<1x128xf32>
    %41 = vector.broadcast %40 : vector<1x128xf32> to vector<8x128xf32>
    %42 = arith.addf %39, %41 : vector<8x128xf32>
    %43 = vector.extract_strided_slice %42 {offsets = [0, 0], sizes = [8, 32], strides = [1, 1]} : vector<8x128xf32> to vector<8x32xf32>
    %44 = arith.negf %43 : vector<8x32xf32>
    %45 = math.exp %44 : vector<8x32xf32>
    %cst_18 = arith.constant 1.000000e+00 : f32
    %46 = vector.broadcast %cst_18 : f32 to vector<8x32xf32>
    %47 = arith.addf %46, %45 : vector<8x32xf32>
    %48 = arith.divf %46, %47 : vector<8x32xf32>
    %49 = vector.extract_strided_slice %42 {offsets = [0, 32], sizes = [8, 32], strides = [1, 1]} : vector<8x128xf32> to vector<8x32xf32>
    %50 = arith.negf %49 : vector<8x32xf32>
    %51 = math.exp %50 : vector<8x32xf32>
    %cst_19 = arith.constant 1.000000e+00 : f32
    %52 = vector.broadcast %cst_19 : f32 to vector<8x32xf32>
    %53 = arith.addf %52, %51 : vector<8x32xf32>
    %54 = arith.divf %52, %53 : vector<8x32xf32>
    %55 = vector.extract_strided_slice %42 {offsets = [0, 64], sizes = [8, 32], strides = [1, 1]} : vector<8x128xf32> to vector<8x32xf32>
    %56 = math.tanh %55 : vector<8x32xf32>
    %57 = vector.extract_strided_slice %42 {offsets = [0, 96], sizes = [8, 32], strides = [1, 1]} : vector<8x128xf32> to vector<8x32xf32>
    %58 = arith.negf %57 : vector<8x32xf32>
    %59 = math.exp %58 : vector<8x32xf32>
    %cst_20 = arith.constant 1.000000e+00 : f32
    %60 = vector.broadcast %cst_20 : f32 to vector<8x32xf32>
    %61 = arith.addf %60, %59 : vector<8x32xf32>
    %62 = arith.divf %60, %61 : vector<8x32xf32>
    %63 = arith.mulf %54, %3 : vector<8x32xf32>
    %64 = arith.mulf %48, %56 : vector<8x32xf32>
    %65 = arith.addf %63, %64 : vector<8x32xf32>
    %66 = math.tanh %65 : vector<8x32xf32>
    %67 = arith.mulf %62, %66 : vector<8x32xf32>
    %c0_21 = arith.constant 0 : index
    %c1 = arith.constant 1 : index
    %c0_22 = arith.constant 0 : index
    %68 = vector.load %arg0[%c0_21, %c1, %c0_22] : memref<8x8x16xf32, #tpu.memory_space<vmem>>, vector<8x1x16xf32>
    %69 = vector.shape_cast %68 : vector<8x1x16xf32> to vector<8x16xf32>
    %70 = tpu.concatenate %69, %36 in 1 : vector<8x16xf32>, vector<8x32xf32> -> vector<8x48xf32>
    %c0_23 = arith.constant 0 : index
    %c0_24 = arith.constant 0 : index
    %71 = vector.load %arg1[%c0_23, %c0_24] : memref<48x128xf32, #tpu.memory_space<vmem>>, vector<48x128xf32>
    %cst_25 = arith.constant dense<0.000000e+00> : vector<8x128xf32>
    %72 = tpu.matmul %70, %71, %cst_25 {dimension_numbers = #tpu.dot_dimension_numbers<[1], [0], [0], [1], [0, 0, 1, 1], [], []>} : vector<8x48xf32>, vector<48x128xf32>, vector<8x128xf32> -> vector<8x128xf32>
    %c0_26 = arith.constant 0 : index
    %c0_27 = arith.constant 0 : index
    %73 = vector.load %arg2[%c0_26, %c0_27] : memref<1x128xf32, #tpu.memory_space<vmem>>, vector<1x128xf32>
    %74 = vector.broadcast %73 : vector<1x128xf32> to vector<8x128xf32>
    %75 = arith.addf %72, %74 : vector<8x128xf32>
    %76 = vector.extract_strided_slice %75 {offsets = [0, 0], sizes = [8, 32], strides = [1, 1]} : vector<8x128xf32> to vector<8x32xf32>
    %77 = arith.negf %76 : vector<8x32xf32>
    %78 = math.exp %77 : vector<8x32xf32>
    %cst_28 = arith.constant 1.000000e+00 : f32
    %79 = vector.broadcast %cst_28 : f32 to vector<8x32xf32>
    %80 = arith.addf %79, %78 : vector<8x32xf32>
    %81 = arith.divf %79, %80 : vector<8x32xf32>
    %82 = vector.extract_strided_slice %75 {offsets = [0, 32], sizes = [8, 32], strides = [1, 1]} : vector<8x128xf32> to vector<8x32xf32>
    %83 = arith.negf %82 : vector<8x32xf32>
    %84 = math.exp %83 : vector<8x32xf32>
    %cst_29 = arith.constant 1.000000e+00 : f32
    %85 = vector.broadcast %cst_29 : f32 to vector<8x32xf32>
    %86 = arith.addf %85, %84 : vector<8x32xf32>
    %87 = arith.divf %85, %86 : vector<8x32xf32>
    %88 = vector.extract_strided_slice %75 {offsets = [0, 64], sizes = [8, 32], strides = [1, 1]} : vector<8x128xf32> to vector<8x32xf32>
    %89 = math.tanh %88 : vector<8x32xf32>
    %90 = vector.extract_strided_slice %75 {offsets = [0, 96], sizes = [8, 32], strides = [1, 1]} : vector<8x128xf32> to vector<8x32xf32>
    %91 = arith.negf %90 : vector<8x32xf32>
    %92 = math.exp %91 : vector<8x32xf32>
    %cst_30 = arith.constant 1.000000e+00 : f32
    %93 = vector.broadcast %cst_30 : f32 to vector<8x32xf32>
    %94 = arith.addf %93, %92 : vector<8x32xf32>
    %95 = arith.divf %93, %94 : vector<8x32xf32>
    %96 = arith.mulf %87, %34 : vector<8x32xf32>
    %97 = arith.mulf %81, %89 : vector<8x32xf32>
    %98 = arith.addf %96, %97 : vector<8x32xf32>
    %99 = math.tanh %98 : vector<8x32xf32>
    %100 = arith.mulf %95, %99 : vector<8x32xf32>
    %101 = tpu.concatenate %100, %67 in 1 : vector<8x32xf32>, vector<8x32xf32> -> vector<8x64xf32>
    %c0_31 = arith.constant 0 : index
    %c0_32 = arith.constant 0 : index
    %102 = vector.load %arg3[%c0_31, %c0_32] : memref<64x128xf32, #tpu.memory_space<vmem>>, vector<64x128xf32>
    %cst_33 = arith.constant dense<0.000000e+00> : vector<8x128xf32>
    %103 = tpu.matmul %101, %102, %cst_33 {dimension_numbers = #tpu.dot_dimension_numbers<[1], [0], [0], [1], [0, 0, 1, 1], [], []>} : vector<8x64xf32>, vector<64x128xf32>, vector<8x128xf32> -> vector<8x128xf32>
    %c0_34 = arith.constant 0 : index
    %c0_35 = arith.constant 0 : index
    %104 = vector.load %arg4[%c0_34, %c0_35] : memref<1x128xf32, #tpu.memory_space<vmem>>, vector<1x128xf32>
    %105 = vector.broadcast %104 : vector<1x128xf32> to vector<8x128xf32>
    %106 = arith.addf %103, %105 : vector<8x128xf32>
    %107 = vector.extract_strided_slice %106 {offsets = [0, 0], sizes = [8, 32], strides = [1, 1]} : vector<8x128xf32> to vector<8x32xf32>
    %108 = arith.negf %107 : vector<8x32xf32>
    %109 = math.exp %108 : vector<8x32xf32>
    %cst_36 = arith.constant 1.000000e+00 : f32
    %110 = vector.broadcast %cst_36 : f32 to vector<8x32xf32>
    %111 = arith.addf %110, %109 : vector<8x32xf32>
    %112 = arith.divf %110, %111 : vector<8x32xf32>
    %113 = vector.extract_strided_slice %106 {offsets = [0, 32], sizes = [8, 32], strides = [1, 1]} : vector<8x128xf32> to vector<8x32xf32>
    %114 = arith.negf %113 : vector<8x32xf32>
    %115 = math.exp %114 : vector<8x32xf32>
    %cst_37 = arith.constant 1.000000e+00 : f32
    %116 = vector.broadcast %cst_37 : f32 to vector<8x32xf32>
    %117 = arith.addf %116, %115 : vector<8x32xf32>
    %118 = arith.divf %116, %117 : vector<8x32xf32>
    %119 = vector.extract_strided_slice %106 {offsets = [0, 64], sizes = [8, 32], strides = [1, 1]} : vector<8x128xf32> to vector<8x32xf32>
    %120 = math.tanh %119 : vector<8x32xf32>
    %121 = vector.extract_strided_slice %106 {offsets = [0, 96], sizes = [8, 32], strides = [1, 1]} : vector<8x128xf32> to vector<8x32xf32>
    %122 = arith.negf %121 : vector<8x32xf32>
    %123 = math.exp %122 : vector<8x32xf32>
    %cst_38 = arith.constant 1.000000e+00 : f32
    %124 = vector.broadcast %cst_38 : f32 to vector<8x32xf32>
    %125 = arith.addf %124, %123 : vector<8x32xf32>
    %126 = arith.divf %124, %125 : vector<8x32xf32>
    %127 = arith.mulf %118, %65 : vector<8x32xf32>
    %128 = arith.mulf %112, %120 : vector<8x32xf32>
    %129 = arith.addf %127, %128 : vector<8x32xf32>
    %130 = math.tanh %129 : vector<8x32xf32>
    %131 = arith.mulf %126, %130 : vector<8x32xf32>
    %c0_39 = arith.constant 0 : index
    %c2 = arith.constant 2 : index
    %c0_40 = arith.constant 0 : index
    %132 = vector.load %arg0[%c0_39, %c2, %c0_40] : memref<8x8x16xf32, #tpu.memory_space<vmem>>, vector<8x1x16xf32>
    %133 = vector.shape_cast %132 : vector<8x1x16xf32> to vector<8x16xf32>
    %134 = tpu.concatenate %133, %100 in 1 : vector<8x16xf32>, vector<8x32xf32> -> vector<8x48xf32>
    %c0_41 = arith.constant 0 : index
    %c0_42 = arith.constant 0 : index
    %135 = vector.load %arg1[%c0_41, %c0_42] : memref<48x128xf32, #tpu.memory_space<vmem>>, vector<48x128xf32>
    %cst_43 = arith.constant dense<0.000000e+00> : vector<8x128xf32>
    %136 = tpu.matmul %134, %135, %cst_43 {dimension_numbers = #tpu.dot_dimension_numbers<[1], [0], [0], [1], [0, 0, 1, 1], [], []>} : vector<8x48xf32>, vector<48x128xf32>, vector<8x128xf32> -> vector<8x128xf32>
    %c0_44 = arith.constant 0 : index
    %c0_45 = arith.constant 0 : index
    %137 = vector.load %arg2[%c0_44, %c0_45] : memref<1x128xf32, #tpu.memory_space<vmem>>, vector<1x128xf32>
    %138 = vector.broadcast %137 : vector<1x128xf32> to vector<8x128xf32>
    %139 = arith.addf %136, %138 : vector<8x128xf32>
    %140 = vector.extract_strided_slice %139 {offsets = [0, 0], sizes = [8, 32], strides = [1, 1]} : vector<8x128xf32> to vector<8x32xf32>
    %141 = arith.negf %140 : vector<8x32xf32>
    %142 = math.exp %141 : vector<8x32xf32>
    %cst_46 = arith.constant 1.000000e+00 : f32
    %143 = vector.broadcast %cst_46 : f32 to vector<8x32xf32>
    %144 = arith.addf %143, %142 : vector<8x32xf32>
    %145 = arith.divf %143, %144 : vector<8x32xf32>
    %146 = vector.extract_strided_slice %139 {offsets = [0, 32], sizes = [8, 32], strides = [1, 1]} : vector<8x128xf32> to vector<8x32xf32>
    %147 = arith.negf %146 : vector<8x32xf32>
    %148 = math.exp %147 : vector<8x32xf32>
    %cst_47 = arith.constant 1.000000e+00 : f32
    %149 = vector.broadcast %cst_47 : f32 to vector<8x32xf32>
    %150 = arith.addf %149, %148 : vector<8x32xf32>
    %151 = arith.divf %149, %150 : vector<8x32xf32>
    %152 = vector.extract_strided_slice %139 {offsets = [0, 64], sizes = [8, 32], strides = [1, 1]} : vector<8x128xf32> to vector<8x32xf32>
    %153 = math.tanh %152 : vector<8x32xf32>
    %154 = vector.extract_strided_slice %139 {offsets = [0, 96], sizes = [8, 32], strides = [1, 1]} : vector<8x128xf32> to vector<8x32xf32>
    %155 = arith.negf %154 : vector<8x32xf32>
    %156 = math.exp %155 : vector<8x32xf32>
    %cst_48 = arith.constant 1.000000e+00 : f32
    %157 = vector.broadcast %cst_48 : f32 to vector<8x32xf32>
    %158 = arith.addf %157, %156 : vector<8x32xf32>
    %159 = arith.divf %157, %158 : vector<8x32xf32>
    %160 = arith.mulf %151, %98 : vector<8x32xf32>
    %161 = arith.mulf %145, %153 : vector<8x32xf32>
    %162 = arith.addf %160, %161 : vector<8x32xf32>
    %163 = math.tanh %162 : vector<8x32xf32>
    %164 = arith.mulf %159, %163 : vector<8x32xf32>
    %165 = tpu.concatenate %164, %131 in 1 : vector<8x32xf32>, vector<8x32xf32> -> vector<8x64xf32>
    %c0_49 = arith.constant 0 : index
    %c0_50 = arith.constant 0 : index
    %166 = vector.load %arg3[%c0_49, %c0_50] : memref<64x128xf32, #tpu.memory_space<vmem>>, vector<64x128xf32>
    %cst_51 = arith.constant dense<0.000000e+00> : vector<8x128xf32>
    %167 = tpu.matmul %165, %166, %cst_51 {dimension_numbers = #tpu.dot_dimension_numbers<[1], [0], [0], [1], [0, 0, 1, 1], [], []>} : vector<8x64xf32>, vector<64x128xf32>, vector<8x128xf32> -> vector<8x128xf32>
    %c0_52 = arith.constant 0 : index
    %c0_53 = arith.constant 0 : index
    %168 = vector.load %arg4[%c0_52, %c0_53] : memref<1x128xf32, #tpu.memory_space<vmem>>, vector<1x128xf32>
    %169 = vector.broadcast %168 : vector<1x128xf32> to vector<8x128xf32>
    %170 = arith.addf %167, %169 : vector<8x128xf32>
    %171 = vector.extract_strided_slice %170 {offsets = [0, 0], sizes = [8, 32], strides = [1, 1]} : vector<8x128xf32> to vector<8x32xf32>
    %172 = arith.negf %171 : vector<8x32xf32>
    %173 = math.exp %172 : vector<8x32xf32>
    %cst_54 = arith.constant 1.000000e+00 : f32
    %174 = vector.broadcast %cst_54 : f32 to vector<8x32xf32>
    %175 = arith.addf %174, %173 : vector<8x32xf32>
    %176 = arith.divf %174, %175 : vector<8x32xf32>
    %177 = vector.extract_strided_slice %170 {offsets = [0, 32], sizes = [8, 32], strides = [1, 1]} : vector<8x128xf32> to vector<8x32xf32>
    %178 = arith.negf %177 : vector<8x32xf32>
    %179 = math.exp %178 : vector<8x32xf32>
    %cst_55 = arith.constant 1.000000e+00 : f32
    %180 = vector.broadcast %cst_55 : f32 to vector<8x32xf32>
    %181 = arith.addf %180, %179 : vector<8x32xf32>
    %182 = arith.divf %180, %181 : vector<8x32xf32>
    %183 = vector.extract_strided_slice %170 {offsets = [0, 64], sizes = [8, 32], strides = [1, 1]} : vector<8x128xf32> to vector<8x32xf32>
    %184 = math.tanh %183 : vector<8x32xf32>
    %185 = vector.extract_strided_slice %170 {offsets = [0, 96], sizes = [8, 32], strides = [1, 1]} : vector<8x128xf32> to vector<8x32xf32>
    %186 = arith.negf %185 : vector<8x32xf32>
    %187 = math.exp %186 : vector<8x32xf32>
    %cst_56 = arith.constant 1.000000e+00 : f32
    %188 = vector.broadcast %cst_56 : f32 to vector<8x32xf32>
    %189 = arith.addf %188, %187 : vector<8x32xf32>
    %190 = arith.divf %188, %189 : vector<8x32xf32>
    %191 = arith.mulf %182, %129 : vector<8x32xf32>
    %192 = arith.mulf %176, %184 : vector<8x32xf32>
    %193 = arith.addf %191, %192 : vector<8x32xf32>
    %194 = math.tanh %193 : vector<8x32xf32>
    %195 = arith.mulf %190, %194 : vector<8x32xf32>
    %c0_57 = arith.constant 0 : index
    %c3 = arith.constant 3 : index
    %c0_58 = arith.constant 0 : index
    %196 = vector.load %arg0[%c0_57, %c3, %c0_58] : memref<8x8x16xf32, #tpu.memory_space<vmem>>, vector<8x1x16xf32>
    %197 = vector.shape_cast %196 : vector<8x1x16xf32> to vector<8x16xf32>
    %198 = tpu.concatenate %197, %164 in 1 : vector<8x16xf32>, vector<8x32xf32> -> vector<8x48xf32>
    %c0_59 = arith.constant 0 : index
    %c0_60 = arith.constant 0 : index
    %199 = vector.load %arg1[%c0_59, %c0_60] : memref<48x128xf32, #tpu.memory_space<vmem>>, vector<48x128xf32>
    %cst_61 = arith.constant dense<0.000000e+00> : vector<8x128xf32>
    %200 = tpu.matmul %198, %199, %cst_61 {dimension_numbers = #tpu.dot_dimension_numbers<[1], [0], [0], [1], [0, 0, 1, 1], [], []>} : vector<8x48xf32>, vector<48x128xf32>, vector<8x128xf32> -> vector<8x128xf32>
    %c0_62 = arith.constant 0 : index
    %c0_63 = arith.constant 0 : index
    %201 = vector.load %arg2[%c0_62, %c0_63] : memref<1x128xf32, #tpu.memory_space<vmem>>, vector<1x128xf32>
    %202 = vector.broadcast %201 : vector<1x128xf32> to vector<8x128xf32>
    %203 = arith.addf %200, %202 : vector<8x128xf32>
    %204 = vector.extract_strided_slice %203 {offsets = [0, 0], sizes = [8, 32], strides = [1, 1]} : vector<8x128xf32> to vector<8x32xf32>
    %205 = arith.negf %204 : vector<8x32xf32>
    %206 = math.exp %205 : vector<8x32xf32>
    %cst_64 = arith.constant 1.000000e+00 : f32
    %207 = vector.broadcast %cst_64 : f32 to vector<8x32xf32>
    %208 = arith.addf %207, %206 : vector<8x32xf32>
    %209 = arith.divf %207, %208 : vector<8x32xf32>
    %210 = vector.extract_strided_slice %203 {offsets = [0, 32], sizes = [8, 32], strides = [1, 1]} : vector<8x128xf32> to vector<8x32xf32>
    %211 = arith.negf %210 : vector<8x32xf32>
    %212 = math.exp %211 : vector<8x32xf32>
    %cst_65 = arith.constant 1.000000e+00 : f32
    %213 = vector.broadcast %cst_65 : f32 to vector<8x32xf32>
    %214 = arith.addf %213, %212 : vector<8x32xf32>
    %215 = arith.divf %213, %214 : vector<8x32xf32>
    %216 = vector.extract_strided_slice %203 {offsets = [0, 64], sizes = [8, 32], strides = [1, 1]} : vector<8x128xf32> to vector<8x32xf32>
    %217 = math.tanh %216 : vector<8x32xf32>
    %218 = vector.extract_strided_slice %203 {offsets = [0, 96], sizes = [8, 32], strides = [1, 1]} : vector<8x128xf32> to vector<8x32xf32>
    %219 = arith.negf %218 : vector<8x32xf32>
    %220 = math.exp %219 : vector<8x32xf32>
    %cst_66 = arith.constant 1.000000e+00 : f32
    %221 = vector.broadcast %cst_66 : f32 to vector<8x32xf32>
    %222 = arith.addf %221, %220 : vector<8x32xf32>
    %223 = arith.divf %221, %222 : vector<8x32xf32>
    %224 = arith.mulf %215, %162 : vector<8x32xf32>
    %225 = arith.mulf %209, %217 : vector<8x32xf32>
    %226 = arith.addf %224, %225 : vector<8x32xf32>
    %227 = math.tanh %226 : vector<8x32xf32>
    %228 = arith.mulf %223, %227 : vector<8x32xf32>
    %229 = tpu.concatenate %228, %195 in 1 : vector<8x32xf32>, vector<8x32xf32> -> vector<8x64xf32>
    %c0_67 = arith.constant 0 : index
    %c0_68 = arith.constant 0 : index
    %230 = vector.load %arg3[%c0_67, %c0_68] : memref<64x128xf32, #tpu.memory_space<vmem>>, vector<64x128xf32>
    %cst_69 = arith.constant dense<0.000000e+00> : vector<8x128xf32>
    %231 = tpu.matmul %229, %230, %cst_69 {dimension_numbers = #tpu.dot_dimension_numbers<[1], [0], [0], [1], [0, 0, 1, 1], [], []>} : vector<8x64xf32>, vector<64x128xf32>, vector<8x128xf32> -> vector<8x128xf32>
    %c0_70 = arith.constant 0 : index
    %c0_71 = arith.constant 0 : index
    %232 = vector.load %arg4[%c0_70, %c0_71] : memref<1x128xf32, #tpu.memory_space<vmem>>, vector<1x128xf32>
    %233 = vector.broadcast %232 : vector<1x128xf32> to vector<8x128xf32>
    %234 = arith.addf %231, %233 : vector<8x128xf32>
    %235 = vector.extract_strided_slice %234 {offsets = [0, 0], sizes = [8, 32], strides = [1, 1]} : vector<8x128xf32> to vector<8x32xf32>
    %236 = arith.negf %235 : vector<8x32xf32>
    %237 = math.exp %236 : vector<8x32xf32>
    %cst_72 = arith.constant 1.000000e+00 : f32
    %238 = vector.broadcast %cst_72 : f32 to vector<8x32xf32>
    %239 = arith.addf %238, %237 : vector<8x32xf32>
    %240 = arith.divf %238, %239 : vector<8x32xf32>
    %241 = vector.extract_strided_slice %234 {offsets = [0, 32], sizes = [8, 32], strides = [1, 1]} : vector<8x128xf32> to vector<8x32xf32>
    %242 = arith.negf %241 : vector<8x32xf32>
    %243 = math.exp %242 : vector<8x32xf32>
    %cst_73 = arith.constant 1.000000e+00 : f32
    %244 = vector.broadcast %cst_73 : f32 to vector<8x32xf32>
    %245 = arith.addf %244, %243 : vector<8x32xf32>
    %246 = arith.divf %244, %245 : vector<8x32xf32>
    %247 = vector.extract_strided_slice %234 {offsets = [0, 64], sizes = [8, 32], strides = [1, 1]} : vector<8x128xf32> to vector<8x32xf32>
    %248 = math.tanh %247 : vector<8x32xf32>
    %249 = vector.extract_strided_slice %234 {offsets = [0, 96], sizes = [8, 32], strides = [1, 1]} : vector<8x128xf32> to vector<8x32xf32>
    %250 = arith.negf %249 : vector<8x32xf32>
    %251 = math.exp %250 : vector<8x32xf32>
    %cst_74 = arith.constant 1.000000e+00 : f32
    %252 = vector.broadcast %cst_74 : f32 to vector<8x32xf32>
    %253 = arith.addf %252, %251 : vector<8x32xf32>
    %254 = arith.divf %252, %253 : vector<8x32xf32>
    %255 = arith.mulf %246, %193 : vector<8x32xf32>
    %256 = arith.mulf %240, %248 : vector<8x32xf32>
    %257 = arith.addf %255, %256 : vector<8x32xf32>
    %258 = math.tanh %257 : vector<8x32xf32>
    %259 = arith.mulf %254, %258 : vector<8x32xf32>
    %c0_75 = arith.constant 0 : index
    %c4 = arith.constant 4 : index
    %c0_76 = arith.constant 0 : index
    %260 = vector.load %arg0[%c0_75, %c4, %c0_76] : memref<8x8x16xf32, #tpu.memory_space<vmem>>, vector<8x1x16xf32>
    %261 = vector.shape_cast %260 : vector<8x1x16xf32> to vector<8x16xf32>
    %262 = tpu.concatenate %261, %228 in 1 : vector<8x16xf32>, vector<8x32xf32> -> vector<8x48xf32>
    %c0_77 = arith.constant 0 : index
    %c0_78 = arith.constant 0 : index
    %263 = vector.load %arg1[%c0_77, %c0_78] : memref<48x128xf32, #tpu.memory_space<vmem>>, vector<48x128xf32>
    %cst_79 = arith.constant dense<0.000000e+00> : vector<8x128xf32>
    %264 = tpu.matmul %262, %263, %cst_79 {dimension_numbers = #tpu.dot_dimension_numbers<[1], [0], [0], [1], [0, 0, 1, 1], [], []>} : vector<8x48xf32>, vector<48x128xf32>, vector<8x128xf32> -> vector<8x128xf32>
    %c0_80 = arith.constant 0 : index
    %c0_81 = arith.constant 0 : index
    %265 = vector.load %arg2[%c0_80, %c0_81] : memref<1x128xf32, #tpu.memory_space<vmem>>, vector<1x128xf32>
    %266 = vector.broadcast %265 : vector<1x128xf32> to vector<8x128xf32>
    %267 = arith.addf %264, %266 : vector<8x128xf32>
    %268 = vector.extract_strided_slice %267 {offsets = [0, 0], sizes = [8, 32], strides = [1, 1]} : vector<8x128xf32> to vector<8x32xf32>
    %269 = arith.negf %268 : vector<8x32xf32>
    %270 = math.exp %269 : vector<8x32xf32>
    %cst_82 = arith.constant 1.000000e+00 : f32
    %271 = vector.broadcast %cst_82 : f32 to vector<8x32xf32>
    %272 = arith.addf %271, %270 : vector<8x32xf32>
    %273 = arith.divf %271, %272 : vector<8x32xf32>
    %274 = vector.extract_strided_slice %267 {offsets = [0, 32], sizes = [8, 32], strides = [1, 1]} : vector<8x128xf32> to vector<8x32xf32>
    %275 = arith.negf %274 : vector<8x32xf32>
    %276 = math.exp %275 : vector<8x32xf32>
    %cst_83 = arith.constant 1.000000e+00 : f32
    %277 = vector.broadcast %cst_83 : f32 to vector<8x32xf32>
    %278 = arith.addf %277, %276 : vector<8x32xf32>
    %279 = arith.divf %277, %278 : vector<8x32xf32>
    %280 = vector.extract_strided_slice %267 {offsets = [0, 64], sizes = [8, 32], strides = [1, 1]} : vector<8x128xf32> to vector<8x32xf32>
    %281 = math.tanh %280 : vector<8x32xf32>
    %282 = vector.extract_strided_slice %267 {offsets = [0, 96], sizes = [8, 32], strides = [1, 1]} : vector<8x128xf32> to vector<8x32xf32>
    %283 = arith.negf %282 : vector<8x32xf32>
    %284 = math.exp %283 : vector<8x32xf32>
    %cst_84 = arith.constant 1.000000e+00 : f32
    %285 = vector.broadcast %cst_84 : f32 to vector<8x32xf32>
    %286 = arith.addf %285, %284 : vector<8x32xf32>
    %287 = arith.divf %285, %286 : vector<8x32xf32>
    %288 = arith.mulf %279, %226 : vector<8x32xf32>
    %289 = arith.mulf %273, %281 : vector<8x32xf32>
    %290 = arith.addf %288, %289 : vector<8x32xf32>
    %291 = math.tanh %290 : vector<8x32xf32>
    %292 = arith.mulf %287, %291 : vector<8x32xf32>
    %293 = tpu.concatenate %292, %259 in 1 : vector<8x32xf32>, vector<8x32xf32> -> vector<8x64xf32>
    %c0_85 = arith.constant 0 : index
    %c0_86 = arith.constant 0 : index
    %294 = vector.load %arg3[%c0_85, %c0_86] : memref<64x128xf32, #tpu.memory_space<vmem>>, vector<64x128xf32>
    %cst_87 = arith.constant dense<0.000000e+00> : vector<8x128xf32>
    %295 = tpu.matmul %293, %294, %cst_87 {dimension_numbers = #tpu.dot_dimension_numbers<[1], [0], [0], [1], [0, 0, 1, 1], [], []>} : vector<8x64xf32>, vector<64x128xf32>, vector<8x128xf32> -> vector<8x128xf32>
    %c0_88 = arith.constant 0 : index
    %c0_89 = arith.constant 0 : index
    %296 = vector.load %arg4[%c0_88, %c0_89] : memref<1x128xf32, #tpu.memory_space<vmem>>, vector<1x128xf32>
    %297 = vector.broadcast %296 : vector<1x128xf32> to vector<8x128xf32>
    %298 = arith.addf %295, %297 : vector<8x128xf32>
    %299 = vector.extract_strided_slice %298 {offsets = [0, 0], sizes = [8, 32], strides = [1, 1]} : vector<8x128xf32> to vector<8x32xf32>
    %300 = arith.negf %299 : vector<8x32xf32>
    %301 = math.exp %300 : vector<8x32xf32>
    %cst_90 = arith.constant 1.000000e+00 : f32
    %302 = vector.broadcast %cst_90 : f32 to vector<8x32xf32>
    %303 = arith.addf %302, %301 : vector<8x32xf32>
    %304 = arith.divf %302, %303 : vector<8x32xf32>
    %305 = vector.extract_strided_slice %298 {offsets = [0, 32], sizes = [8, 32], strides = [1, 1]} : vector<8x128xf32> to vector<8x32xf32>
    %306 = arith.negf %305 : vector<8x32xf32>
    %307 = math.exp %306 : vector<8x32xf32>
    %cst_91 = arith.constant 1.000000e+00 : f32
    %308 = vector.broadcast %cst_91 : f32 to vector<8x32xf32>
    %309 = arith.addf %308, %307 : vector<8x32xf32>
    %310 = arith.divf %308, %309 : vector<8x32xf32>
    %311 = vector.extract_strided_slice %298 {offsets = [0, 64], sizes = [8, 32], strides = [1, 1]} : vector<8x128xf32> to vector<8x32xf32>
    %312 = math.tanh %311 : vector<8x32xf32>
    %313 = vector.extract_strided_slice %298 {offsets = [0, 96], sizes = [8, 32], strides = [1, 1]} : vector<8x128xf32> to vector<8x32xf32>
    %314 = arith.negf %313 : vector<8x32xf32>
    %315 = math.exp %314 : vector<8x32xf32>
    %cst_92 = arith.constant 1.000000e+00 : f32
    %316 = vector.broadcast %cst_92 : f32 to vector<8x32xf32>
    %317 = arith.addf %316, %315 : vector<8x32xf32>
    %318 = arith.divf %316, %317 : vector<8x32xf32>
    %319 = arith.mulf %310, %257 : vector<8x32xf32>
    %320 = arith.mulf %304, %312 : vector<8x32xf32>
    %321 = arith.addf %319, %320 : vector<8x32xf32>
    %322 = math.tanh %321 : vector<8x32xf32>
    %323 = arith.mulf %318, %322 : vector<8x32xf32>
    %c0_93 = arith.constant 0 : index
    %c5 = arith.constant 5 : index
    %c0_94 = arith.constant 0 : index
    %324 = vector.load %arg0[%c0_93, %c5, %c0_94] : memref<8x8x16xf32, #tpu.memory_space<vmem>>, vector<8x1x16xf32>
    %325 = vector.shape_cast %324 : vector<8x1x16xf32> to vector<8x16xf32>
    %326 = tpu.concatenate %325, %292 in 1 : vector<8x16xf32>, vector<8x32xf32> -> vector<8x48xf32>
    %c0_95 = arith.constant 0 : index
    %c0_96 = arith.constant 0 : index
    %327 = vector.load %arg1[%c0_95, %c0_96] : memref<48x128xf32, #tpu.memory_space<vmem>>, vector<48x128xf32>
    %cst_97 = arith.constant dense<0.000000e+00> : vector<8x128xf32>
    %328 = tpu.matmul %326, %327, %cst_97 {dimension_numbers = #tpu.dot_dimension_numbers<[1], [0], [0], [1], [0, 0, 1, 1], [], []>} : vector<8x48xf32>, vector<48x128xf32>, vector<8x128xf32> -> vector<8x128xf32>
    %c0_98 = arith.constant 0 : index
    %c0_99 = arith.constant 0 : index
    %329 = vector.load %arg2[%c0_98, %c0_99] : memref<1x128xf32, #tpu.memory_space<vmem>>, vector<1x128xf32>
    %330 = vector.broadcast %329 : vector<1x128xf32> to vector<8x128xf32>
    %331 = arith.addf %328, %330 : vector<8x128xf32>
    %332 = vector.extract_strided_slice %331 {offsets = [0, 0], sizes = [8, 32], strides = [1, 1]} : vector<8x128xf32> to vector<8x32xf32>
    %333 = arith.negf %332 : vector<8x32xf32>
    %334 = math.exp %333 : vector<8x32xf32>
    %cst_100 = arith.constant 1.000000e+00 : f32
    %335 = vector.broadcast %cst_100 : f32 to vector<8x32xf32>
    %336 = arith.addf %335, %334 : vector<8x32xf32>
    %337 = arith.divf %335, %336 : vector<8x32xf32>
    %338 = vector.extract_strided_slice %331 {offsets = [0, 32], sizes = [8, 32], strides = [1, 1]} : vector<8x128xf32> to vector<8x32xf32>
    %339 = arith.negf %338 : vector<8x32xf32>
    %340 = math.exp %339 : vector<8x32xf32>
    %cst_101 = arith.constant 1.000000e+00 : f32
    %341 = vector.broadcast %cst_101 : f32 to vector<8x32xf32>
    %342 = arith.addf %341, %340 : vector<8x32xf32>
    %343 = arith.divf %341, %342 : vector<8x32xf32>
    %344 = vector.extract_strided_slice %331 {offsets = [0, 64], sizes = [8, 32], strides = [1, 1]} : vector<8x128xf32> to vector<8x32xf32>
    %345 = math.tanh %344 : vector<8x32xf32>
    %346 = vector.extract_strided_slice %331 {offsets = [0, 96], sizes = [8, 32], strides = [1, 1]} : vector<8x128xf32> to vector<8x32xf32>
    %347 = arith.negf %346 : vector<8x32xf32>
    %348 = math.exp %347 : vector<8x32xf32>
    %cst_102 = arith.constant 1.000000e+00 : f32
    %349 = vector.broadcast %cst_102 : f32 to vector<8x32xf32>
    %350 = arith.addf %349, %348 : vector<8x32xf32>
    %351 = arith.divf %349, %350 : vector<8x32xf32>
    %352 = arith.mulf %343, %290 : vector<8x32xf32>
    %353 = arith.mulf %337, %345 : vector<8x32xf32>
    %354 = arith.addf %352, %353 : vector<8x32xf32>
    %355 = math.tanh %354 : vector<8x32xf32>
    %356 = arith.mulf %351, %355 : vector<8x32xf32>
    %357 = tpu.concatenate %356, %323 in 1 : vector<8x32xf32>, vector<8x32xf32> -> vector<8x64xf32>
    %c0_103 = arith.constant 0 : index
    %c0_104 = arith.constant 0 : index
    %358 = vector.load %arg3[%c0_103, %c0_104] : memref<64x128xf32, #tpu.memory_space<vmem>>, vector<64x128xf32>
    %cst_105 = arith.constant dense<0.000000e+00> : vector<8x128xf32>
    %359 = tpu.matmul %357, %358, %cst_105 {dimension_numbers = #tpu.dot_dimension_numbers<[1], [0], [0], [1], [0, 0, 1, 1], [], []>} : vector<8x64xf32>, vector<64x128xf32>, vector<8x128xf32> -> vector<8x128xf32>
    %c0_106 = arith.constant 0 : index
    %c0_107 = arith.constant 0 : index
    %360 = vector.load %arg4[%c0_106, %c0_107] : memref<1x128xf32, #tpu.memory_space<vmem>>, vector<1x128xf32>
    %361 = vector.broadcast %360 : vector<1x128xf32> to vector<8x128xf32>
    %362 = arith.addf %359, %361 : vector<8x128xf32>
    %363 = vector.extract_strided_slice %362 {offsets = [0, 0], sizes = [8, 32], strides = [1, 1]} : vector<8x128xf32> to vector<8x32xf32>
    %364 = arith.negf %363 : vector<8x32xf32>
    %365 = math.exp %364 : vector<8x32xf32>
    %cst_108 = arith.constant 1.000000e+00 : f32
    %366 = vector.broadcast %cst_108 : f32 to vector<8x32xf32>
    %367 = arith.addf %366, %365 : vector<8x32xf32>
    %368 = arith.divf %366, %367 : vector<8x32xf32>
    %369 = vector.extract_strided_slice %362 {offsets = [0, 32], sizes = [8, 32], strides = [1, 1]} : vector<8x128xf32> to vector<8x32xf32>
    %370 = arith.negf %369 : vector<8x32xf32>
    %371 = math.exp %370 : vector<8x32xf32>
    %cst_109 = arith.constant 1.000000e+00 : f32
    %372 = vector.broadcast %cst_109 : f32 to vector<8x32xf32>
    %373 = arith.addf %372, %371 : vector<8x32xf32>
    %374 = arith.divf %372, %373 : vector<8x32xf32>
    %375 = vector.extract_strided_slice %362 {offsets = [0, 64], sizes = [8, 32], strides = [1, 1]} : vector<8x128xf32> to vector<8x32xf32>
    %376 = math.tanh %375 : vector<8x32xf32>
    %377 = vector.extract_strided_slice %362 {offsets = [0, 96], sizes = [8, 32], strides = [1, 1]} : vector<8x128xf32> to vector<8x32xf32>
    %378 = arith.negf %377 : vector<8x32xf32>
    %379 = math.exp %378 : vector<8x32xf32>
    %cst_110 = arith.constant 1.000000e+00 : f32
    %380 = vector.broadcast %cst_110 : f32 to vector<8x32xf32>
    %381 = arith.addf %380, %379 : vector<8x32xf32>
    %382 = arith.divf %380, %381 : vector<8x32xf32>
    %383 = arith.mulf %374, %321 : vector<8x32xf32>
    %384 = arith.mulf %368, %376 : vector<8x32xf32>
    %385 = arith.addf %383, %384 : vector<8x32xf32>
    %386 = math.tanh %385 : vector<8x32xf32>
    %387 = arith.mulf %382, %386 : vector<8x32xf32>
    %c0_111 = arith.constant 0 : index
    %c6 = arith.constant 6 : index
    %c0_112 = arith.constant 0 : index
    %388 = vector.load %arg0[%c0_111, %c6, %c0_112] : memref<8x8x16xf32, #tpu.memory_space<vmem>>, vector<8x1x16xf32>
    %389 = vector.shape_cast %388 : vector<8x1x16xf32> to vector<8x16xf32>
    %390 = tpu.concatenate %389, %356 in 1 : vector<8x16xf32>, vector<8x32xf32> -> vector<8x48xf32>
    %c0_113 = arith.constant 0 : index
    %c0_114 = arith.constant 0 : index
    %391 = vector.load %arg1[%c0_113, %c0_114] : memref<48x128xf32, #tpu.memory_space<vmem>>, vector<48x128xf32>
    %cst_115 = arith.constant dense<0.000000e+00> : vector<8x128xf32>
    %392 = tpu.matmul %390, %391, %cst_115 {dimension_numbers = #tpu.dot_dimension_numbers<[1], [0], [0], [1], [0, 0, 1, 1], [], []>} : vector<8x48xf32>, vector<48x128xf32>, vector<8x128xf32> -> vector<8x128xf32>
    %c0_116 = arith.constant 0 : index
    %c0_117 = arith.constant 0 : index
    %393 = vector.load %arg2[%c0_116, %c0_117] : memref<1x128xf32, #tpu.memory_space<vmem>>, vector<1x128xf32>
    %394 = vector.broadcast %393 : vector<1x128xf32> to vector<8x128xf32>
    %395 = arith.addf %392, %394 : vector<8x128xf32>
    %396 = vector.extract_strided_slice %395 {offsets = [0, 0], sizes = [8, 32], strides = [1, 1]} : vector<8x128xf32> to vector<8x32xf32>
    %397 = arith.negf %396 : vector<8x32xf32>
    %398 = math.exp %397 : vector<8x32xf32>
    %cst_118 = arith.constant 1.000000e+00 : f32
    %399 = vector.broadcast %cst_118 : f32 to vector<8x32xf32>
    %400 = arith.addf %399, %398 : vector<8x32xf32>
    %401 = arith.divf %399, %400 : vector<8x32xf32>
    %402 = vector.extract_strided_slice %395 {offsets = [0, 32], sizes = [8, 32], strides = [1, 1]} : vector<8x128xf32> to vector<8x32xf32>
    %403 = arith.negf %402 : vector<8x32xf32>
    %404 = math.exp %403 : vector<8x32xf32>
    %cst_119 = arith.constant 1.000000e+00 : f32
    %405 = vector.broadcast %cst_119 : f32 to vector<8x32xf32>
    %406 = arith.addf %405, %404 : vector<8x32xf32>
    %407 = arith.divf %405, %406 : vector<8x32xf32>
    %408 = vector.extract_strided_slice %395 {offsets = [0, 64], sizes = [8, 32], strides = [1, 1]} : vector<8x128xf32> to vector<8x32xf32>
    %409 = math.tanh %408 : vector<8x32xf32>
    %410 = vector.extract_strided_slice %395 {offsets = [0, 96], sizes = [8, 32], strides = [1, 1]} : vector<8x128xf32> to vector<8x32xf32>
    %411 = arith.negf %410 : vector<8x32xf32>
    %412 = math.exp %411 : vector<8x32xf32>
    %cst_120 = arith.constant 1.000000e+00 : f32
    %413 = vector.broadcast %cst_120 : f32 to vector<8x32xf32>
    %414 = arith.addf %413, %412 : vector<8x32xf32>
    %415 = arith.divf %413, %414 : vector<8x32xf32>
    %416 = arith.mulf %407, %354 : vector<8x32xf32>
    %417 = arith.mulf %401, %409 : vector<8x32xf32>
    %418 = arith.addf %416, %417 : vector<8x32xf32>
    %419 = math.tanh %418 : vector<8x32xf32>
    %420 = arith.mulf %415, %419 : vector<8x32xf32>
    %421 = tpu.concatenate %420, %387 in 1 : vector<8x32xf32>, vector<8x32xf32> -> vector<8x64xf32>
    %c0_121 = arith.constant 0 : index
    %c0_122 = arith.constant 0 : index
    %422 = vector.load %arg3[%c0_121, %c0_122] : memref<64x128xf32, #tpu.memory_space<vmem>>, vector<64x128xf32>
    %cst_123 = arith.constant dense<0.000000e+00> : vector<8x128xf32>
    %423 = tpu.matmul %421, %422, %cst_123 {dimension_numbers = #tpu.dot_dimension_numbers<[1], [0], [0], [1], [0, 0, 1, 1], [], []>} : vector<8x64xf32>, vector<64x128xf32>, vector<8x128xf32> -> vector<8x128xf32>
    %c0_124 = arith.constant 0 : index
    %c0_125 = arith.constant 0 : index
    %424 = vector.load %arg4[%c0_124, %c0_125] : memref<1x128xf32, #tpu.memory_space<vmem>>, vector<1x128xf32>
    %425 = vector.broadcast %424 : vector<1x128xf32> to vector<8x128xf32>
    %426 = arith.addf %423, %425 : vector<8x128xf32>
    %427 = vector.extract_strided_slice %426 {offsets = [0, 0], sizes = [8, 32], strides = [1, 1]} : vector<8x128xf32> to vector<8x32xf32>
    %428 = arith.negf %427 : vector<8x32xf32>
    %429 = math.exp %428 : vector<8x32xf32>
    %cst_126 = arith.constant 1.000000e+00 : f32
    %430 = vector.broadcast %cst_126 : f32 to vector<8x32xf32>
    %431 = arith.addf %430, %429 : vector<8x32xf32>
    %432 = arith.divf %430, %431 : vector<8x32xf32>
    %433 = vector.extract_strided_slice %426 {offsets = [0, 32], sizes = [8, 32], strides = [1, 1]} : vector<8x128xf32> to vector<8x32xf32>
    %434 = arith.negf %433 : vector<8x32xf32>
    %435 = math.exp %434 : vector<8x32xf32>
    %cst_127 = arith.constant 1.000000e+00 : f32
    %436 = vector.broadcast %cst_127 : f32 to vector<8x32xf32>
    %437 = arith.addf %436, %435 : vector<8x32xf32>
    %438 = arith.divf %436, %437 : vector<8x32xf32>
    %439 = vector.extract_strided_slice %426 {offsets = [0, 64], sizes = [8, 32], strides = [1, 1]} : vector<8x128xf32> to vector<8x32xf32>
    %440 = math.tanh %439 : vector<8x32xf32>
    %441 = vector.extract_strided_slice %426 {offsets = [0, 96], sizes = [8, 32], strides = [1, 1]} : vector<8x128xf32> to vector<8x32xf32>
    %442 = arith.negf %441 : vector<8x32xf32>
    %443 = math.exp %442 : vector<8x32xf32>
    %cst_128 = arith.constant 1.000000e+00 : f32
    %444 = vector.broadcast %cst_128 : f32 to vector<8x32xf32>
    %445 = arith.addf %444, %443 : vector<8x32xf32>
    %446 = arith.divf %444, %445 : vector<8x32xf32>
    %447 = arith.mulf %438, %385 : vector<8x32xf32>
    %448 = arith.mulf %432, %440 : vector<8x32xf32>
    %449 = arith.addf %447, %448 : vector<8x32xf32>
    %450 = math.tanh %449 : vector<8x32xf32>
    %451 = arith.mulf %446, %450 : vector<8x32xf32>
    %c0_129 = arith.constant 0 : index
    %c7 = arith.constant 7 : index
    %c0_130 = arith.constant 0 : index
    %452 = vector.load %arg0[%c0_129, %c7, %c0_130] : memref<8x8x16xf32, #tpu.memory_space<vmem>>, vector<8x1x16xf32>
    %453 = vector.shape_cast %452 : vector<8x1x16xf32> to vector<8x16xf32>
    %454 = tpu.concatenate %453, %420 in 1 : vector<8x16xf32>, vector<8x32xf32> -> vector<8x48xf32>
    %c0_131 = arith.constant 0 : index
    %c0_132 = arith.constant 0 : index
    %455 = vector.load %arg1[%c0_131, %c0_132] : memref<48x128xf32, #tpu.memory_space<vmem>>, vector<48x128xf32>
    %cst_133 = arith.constant dense<0.000000e+00> : vector<8x128xf32>
    %456 = tpu.matmul %454, %455, %cst_133 {dimension_numbers = #tpu.dot_dimension_numbers<[1], [0], [0], [1], [0, 0, 1, 1], [], []>} : vector<8x48xf32>, vector<48x128xf32>, vector<8x128xf32> -> vector<8x128xf32>
    %c0_134 = arith.constant 0 : index
    %c0_135 = arith.constant 0 : index
    %457 = vector.load %arg2[%c0_134, %c0_135] : memref<1x128xf32, #tpu.memory_space<vmem>>, vector<1x128xf32>
    %458 = vector.broadcast %457 : vector<1x128xf32> to vector<8x128xf32>
    %459 = arith.addf %456, %458 : vector<8x128xf32>
    %460 = vector.extract_strided_slice %459 {offsets = [0, 0], sizes = [8, 32], strides = [1, 1]} : vector<8x128xf32> to vector<8x32xf32>
    %461 = arith.negf %460 : vector<8x32xf32>
    %462 = math.exp %461 : vector<8x32xf32>
    %cst_136 = arith.constant 1.000000e+00 : f32
    %463 = vector.broadcast %cst_136 : f32 to vector<8x32xf32>
    %464 = arith.addf %463, %462 : vector<8x32xf32>
    %465 = arith.divf %463, %464 : vector<8x32xf32>
    %466 = vector.extract_strided_slice %459 {offsets = [0, 32], sizes = [8, 32], strides = [1, 1]} : vector<8x128xf32> to vector<8x32xf32>
    %467 = arith.negf %466 : vector<8x32xf32>
    %468 = math.exp %467 : vector<8x32xf32>
    %cst_137 = arith.constant 1.000000e+00 : f32
    %469 = vector.broadcast %cst_137 : f32 to vector<8x32xf32>
    %470 = arith.addf %469, %468 : vector<8x32xf32>
    %471 = arith.divf %469, %470 : vector<8x32xf32>
    %472 = vector.extract_strided_slice %459 {offsets = [0, 64], sizes = [8, 32], strides = [1, 1]} : vector<8x128xf32> to vector<8x32xf32>
    %473 = math.tanh %472 : vector<8x32xf32>
    %474 = vector.extract_strided_slice %459 {offsets = [0, 96], sizes = [8, 32], strides = [1, 1]} : vector<8x128xf32> to vector<8x32xf32>
    %475 = arith.negf %474 : vector<8x32xf32>
    %476 = math.exp %475 : vector<8x32xf32>
    %cst_138 = arith.constant 1.000000e+00 : f32
    %477 = vector.broadcast %cst_138 : f32 to vector<8x32xf32>
    %478 = arith.addf %477, %476 : vector<8x32xf32>
    %479 = arith.divf %477, %478 : vector<8x32xf32>
    %480 = arith.mulf %471, %418 : vector<8x32xf32>
    %481 = arith.mulf %465, %473 : vector<8x32xf32>
    %482 = arith.addf %480, %481 : vector<8x32xf32>
    %483 = math.tanh %482 : vector<8x32xf32>
    %484 = arith.mulf %479, %483 : vector<8x32xf32>
    %485 = tpu.concatenate %484, %451 in 1 : vector<8x32xf32>, vector<8x32xf32> -> vector<8x64xf32>
    %c0_139 = arith.constant 0 : index
    %c0_140 = arith.constant 0 : index
    %486 = vector.load %arg3[%c0_139, %c0_140] : memref<64x128xf32, #tpu.memory_space<vmem>>, vector<64x128xf32>
    %cst_141 = arith.constant dense<0.000000e+00> : vector<8x128xf32>
    %487 = tpu.matmul %485, %486, %cst_141 {dimension_numbers = #tpu.dot_dimension_numbers<[1], [0], [0], [1], [0, 0, 1, 1], [], []>} : vector<8x64xf32>, vector<64x128xf32>, vector<8x128xf32> -> vector<8x128xf32>
    %c0_142 = arith.constant 0 : index
    %c0_143 = arith.constant 0 : index
    %488 = vector.load %arg4[%c0_142, %c0_143] : memref<1x128xf32, #tpu.memory_space<vmem>>, vector<1x128xf32>
    %489 = vector.broadcast %488 : vector<1x128xf32> to vector<8x128xf32>
    %490 = arith.addf %487, %489 : vector<8x128xf32>
    %491 = vector.extract_strided_slice %490 {offsets = [0, 0], sizes = [8, 32], strides = [1, 1]} : vector<8x128xf32> to vector<8x32xf32>
    %492 = arith.negf %491 : vector<8x32xf32>
    %493 = math.exp %492 : vector<8x32xf32>
    %cst_144 = arith.constant 1.000000e+00 : f32
    %494 = vector.broadcast %cst_144 : f32 to vector<8x32xf32>
    %495 = arith.addf %494, %493 : vector<8x32xf32>
    %496 = arith.divf %494, %495 : vector<8x32xf32>
    %497 = vector.extract_strided_slice %490 {offsets = [0, 32], sizes = [8, 32], strides = [1, 1]} : vector<8x128xf32> to vector<8x32xf32>
    %498 = arith.negf %497 : vector<8x32xf32>
    %499 = math.exp %498 : vector<8x32xf32>
    %cst_145 = arith.constant 1.000000e+00 : f32
    %500 = vector.broadcast %cst_145 : f32 to vector<8x32xf32>
    %501 = arith.addf %500, %499 : vector<8x32xf32>
    %502 = arith.divf %500, %501 : vector<8x32xf32>
    %503 = vector.extract_strided_slice %490 {offsets = [0, 64], sizes = [8, 32], strides = [1, 1]} : vector<8x128xf32> to vector<8x32xf32>
    %504 = math.tanh %503 : vector<8x32xf32>
    %505 = vector.extract_strided_slice %490 {offsets = [0, 96], sizes = [8, 32], strides = [1, 1]} : vector<8x128xf32> to vector<8x32xf32>
    %506 = arith.negf %505 : vector<8x32xf32>
    %507 = math.exp %506 : vector<8x32xf32>
    %cst_146 = arith.constant 1.000000e+00 : f32
    %508 = vector.broadcast %cst_146 : f32 to vector<8x32xf32>
    %509 = arith.addf %508, %507 : vector<8x32xf32>
    %510 = arith.divf %508, %509 : vector<8x32xf32>
    %511 = arith.mulf %502, %449 : vector<8x32xf32>
    %512 = arith.mulf %496, %504 : vector<8x32xf32>
    %513 = arith.addf %511, %512 : vector<8x32xf32>
    %514 = math.tanh %513 : vector<8x32xf32>
    %515 = arith.mulf %510, %514 : vector<8x32xf32>
    %c0_147 = arith.constant 0 : index
    %c0_148 = arith.constant 0 : index
    %516 = vector.load %arg5[%c0_147, %c0_148] : memref<32x128xf32, #tpu.memory_space<vmem>>, vector<32x128xf32>
    %cst_149 = arith.constant dense<0.000000e+00> : vector<8x128xf32>
    %517 = tpu.matmul %515, %516, %cst_149 {dimension_numbers = #tpu.dot_dimension_numbers<[1], [0], [0], [1], [0, 0, 1, 1], [], []>} : vector<8x32xf32>, vector<32x128xf32>, vector<8x128xf32> -> vector<8x128xf32>
    %c0_150 = arith.constant 0 : index
    %c0_151 = arith.constant 0 : index
    %518 = vector.load %arg6[%c0_150, %c0_151] : memref<1x128xf32, #tpu.memory_space<vmem>>, vector<1x128xf32>
    %519 = vector.broadcast %518 : vector<1x128xf32> to vector<8x128xf32>
    %520 = arith.addf %517, %519 : vector<8x128xf32>
    %c0_152 = arith.constant 0 : index
    %c0_153 = arith.constant 0 : index
    %521 = vector.load %arg7[%c0_152, %c0_153] : memref<128x64xf32, #tpu.memory_space<vmem>>, vector<128x64xf32>
    %cst_154 = arith.constant dense<0.000000e+00> : vector<8x64xf32>
    %522 = tpu.matmul %520, %521, %cst_154 {dimension_numbers = #tpu.dot_dimension_numbers<[1], [0], [0], [1], [0, 0, 1, 1], [], []>} : vector<8x128xf32>, vector<128x64xf32>, vector<8x64xf32> -> vector<8x64xf32>
    %c0_155 = arith.constant 0 : index
    %c0_156 = arith.constant 0 : index
    %523 = vector.load %arg8[%c0_155, %c0_156] : memref<1x64xf32, #tpu.memory_space<vmem>>, vector<1x64xf32>
    %524 = vector.broadcast %523 : vector<1x64xf32> to vector<8x64xf32>
    %525 = arith.addf %522, %524 : vector<8x64xf32>
    %c0_157 = arith.constant 0 : index
    %c0_158 = arith.constant 0 : index
    %526 = vector.load %arg9[%c0_157, %c0_158] : memref<64x8xf32, #tpu.memory_space<vmem>>, vector<64x8xf32>
    %cst_159 = arith.constant dense<0.000000e+00> : vector<8x8xf32>
    %527 = tpu.matmul %525, %526, %cst_159 {dimension_numbers = #tpu.dot_dimension_numbers<[1], [0], [0], [1], [0, 0, 1, 1], [], []>} : vector<8x64xf32>, vector<64x8xf32>, vector<8x8xf32> -> vector<8x8xf32>
    %c0_160 = arith.constant 0 : index
    %c0_161 = arith.constant 0 : index
    %528 = vector.load %arg10[%c0_160, %c0_161] : memref<1x8xf32, #tpu.memory_space<vmem>>, vector<1x8xf32>
    %529 = vector.broadcast %528 : vector<1x8xf32> to vector<8x8xf32>
    %530 = arith.addf %527, %529 : vector<8x8xf32>
    %c0_162 = arith.constant 0 : index
    %c0_163 = arith.constant 0 : index
    %531 = vector.load %arg11[%c0_162, %c0_163] : memref<8x8xf32, #tpu.memory_space<vmem>>, vector<8x8xf32>
    tpu.vector_store %arg11[%c0_162, %c0_163], %530 {strides = array<i32>} : memref<8x8xf32, #tpu.memory_space<vmem>>, vector<8x8xf32>,
    return
  }
}

</mosaic_0001>

<bundles_post_ra>
// kernel: tpu_custom_call.1
= control target key start
LH: loop header
LB: loop body
LE: loop exit
PB: predicated region body
PF: predicated region fallthrough
CT: control target
= control target key end

     0   :  { %16 = vsyncpa [#allocation3], 0  ;;  %s4136_s0 = inlined_call_operand.vmem [shape: f32[8,8,16], index: 0, kind: input, shape index: {}]   ;;  %s4137_s1 = inlined_call_operand.vmem [shape: f32[48,128], index: 1, kind: input, shape index: {}]   ;;  %s4138_s2 = inlined_call_operand.hbm [shape: f32[1,128], index: 2, kind: input, shape index: {}]   ;;  %s4139_s3 = inlined_call_operand.vmem [shape: f32[64,128], index: 3, kind: input, shape index: {}]   ;;  %s4140_s4 = inlined_call_operand.hbm [shape: f32[1,128], index: 4, kind: input, shape index: {}]   ;;  %s4141_s5 = inlined_call_operand.vmem [shape: f32[32,128], index: 5, kind: input, shape index: {}]   ;;  %s4142_s6 = inlined_call_operand.hbm [shape: f32[1,128], index: 6, kind: input, shape index: {}]   ;;  %s4143_s7 = inlined_call_operand.vmem [shape: f32[128,64], index: 7, kind: input, shape index: {}]   ;;  %s4144_s8 = inlined_call_operand.hbm [shape: f32[1,64], index: 8, kind: input, shape index: {}]   ;;  %s4145_s9 = inlined_call_operand.vmem [shape: f32[64,8], index: 9, kind: input, shape index: {}]   ;;  %s4146_s10 = inlined_call_operand.vmem [shape: f32[1,8], index: 10, kind: input, shape index: {}]   ;;  %s4147_s11 = inlined_call_operand.hbm [shape: f32[8,8], index: 11, kind: output, shape index: {}]  }
   0x1   :  { %17 = vsyncpa [#allocation6], 0 }
   0x2   :  { %18 = vsyncpa [#allocation9], 0 }
   0x3   :  { %19 = vsyncpa [#allocation4], 0  ;;  %s3105_s17 = smov [#allocation5]   ;;  %s3106_s19 = smov [#allocation2]  }
   0x4   :  { %s42_s18 = sshll.u32 %s3105_s17, 4  ;;  %s30_s20 = sshll.u32 %s3106_s19, 4  ;;  %s43_s18 = int_to_ptr.vmem [resolvable:$true] %s42_s18  ;;  %s31_s20 = int_to_ptr.vmem [resolvable:$true] %s30_s20 }
   0x5   :  { %s3005_s21 = scalar_lea.vmem %s43_s18, 16  ;;  %s3009_s22 = scalar_lea.vmem %s43_s18, 32 }
   0x6   :  { %p3006_p0 = scmp.ne.s32.totalorder %s43_s18, %s3005_s21  ;;  %p3010_p1 = scmp.lt.s32.totalorder %s43_s18, %s43_s18 }
   0x7   :  { %p3011_p2 = scmp.lt.s32.totalorder %s3009_s22, %s3005_s21 }
   0x9   :  { %p3012_p3 = por %p3011_p2, %p3010_p1 }
   0xb   :  { %p3013_p4 = pnand %p3012_p3, %p3006_p0 }
   0xd   :  { %3016 = shalt.err (!%p3013_p4)
}
   0xe   :  { %45 = dma.hbm_to_vmem [thread:$0]  %s4140_s4, 16, %s43_s18, [#allocation6]  }
   0xf   :  { %s3025_s25 = scalar_lea.vmem %s31_s20, 16  ;;  %s3029_s26 = scalar_lea.vmem %s31_s20, 32 }
  0x10   :  { %p3026_p5 = scmp.ne.s32.totalorder %s31_s20, %s3025_s25  ;;  %p3030_p6 = scmp.lt.s32.totalorder %s31_s20, %s31_s20 }
  0x11   :  { %p3031_p7 = scmp.lt.s32.totalorder %s3029_s26, %s3025_s25 }
  0x13   :  { %p3032_p8 = por %p3031_p7, %p3030_p6 }
  0x15   :  { %p3033_p9 = pnand %p3032_p8, %p3026_p5 }
  0x17   :  { %3036 = shalt.err (!%p3033_p9)
}
  0x18   :  { %33 = dma.hbm_to_vmem [thread:$0]  %s4138_s2, 16, %s31_s20, [#allocation3]  }
  0x19   :  { %s3107_s29 = smov [#allocation7]   ;;  %s3108_s12 = smov [#allocation8]  }
  0x1a   :  { %s54_s30 = sshll.u32 %s3107_s29, 4  ;;  %s66_s13 = sshll.u32 %s3108_s12, 4  ;;  %s55_s30 = int_to_ptr.vmem [resolvable:$true] %s54_s30  ;;  %s67_s13 = int_to_ptr.vmem [resolvable:$true] %s66_s13 }
  0x1b   :  { %s3045_s14 = scalar_lea.vmem %s55_s30, 16  ;;  %s3049_s4 = scalar_lea.vmem %s55_s30, 32 }
  0x1c   :  { %p3046_p10 = scmp.ne.s32.totalorder %s55_s30, %s3045_s14  ;;  %p3050_p11 = scmp.lt.s32.totalorder %s55_s30, %s55_s30 }
  0x1d   :  { %p3051_p12 = scmp.lt.s32.totalorder %s3049_s4, %s3045_s14 }
  0x1f   :  { %p3052_p13 = por %p3051_p12, %p3050_p11 }
  0x21   :  { %p3053_p0 = pnand %p3052_p13, %p3046_p10 }
  0x23   :  { %3056 = shalt.err (!%p3053_p0)
}
  0x24   :  { %57 = dma.hbm_to_vmem [thread:$0]  %s4142_s6, 16, %s55_s30, [#allocation6]  }
  0x25   :  { %s3065_s17 = scalar_lea.vmem %s67_s13, 16  ;;  %s3069_s2 = scalar_lea.vmem %s67_s13, 32 }
  0x26   :  { %p3066_p1 = scmp.ne.s32.totalorder %s67_s13, %s3065_s17  ;;  %p3070_p2 = scmp.lt.s32.totalorder %s67_s13, %s67_s13 }
  0x27   :  { %p3071_p3 = scmp.lt.s32.totalorder %s3069_s2, %s3065_s17 }
  0x29   :  { %p3072_p4 = por %p3071_p3, %p3070_p2 }
  0x2b   :  { %p3073_p5 = pnand %p3072_p4, %p3066_p1 }
  0x2d   :  { %3076 = shalt.err (!%p3073_p5)
}
  0x2e   :  { %69 = dma.hbm_to_vmem [thread:$0]  %s4144_s8, 16, %s67_s13, [#allocation9]  }
  0x2f   :  { %3097 = dma.done.wait [#allocation3], 16  }
  0x30   :  { %3098 = vsyncadd [#allocation3], 4294967280 }
  0x31   :  { %3099 = dma.done.wait [#allocation6], 32  }
  0x32   :  { %3100 = vsyncadd [#allocation6], 4294967264 }
  0x33   :  { %3101 = dma.done.wait [#allocation9], 16  }
  0x34   :  { %3102 = vsyncadd [#allocation9], 4294967280  ;;  %v3109_v0 = vmov 0.0   ;;  %vm3110_vm0 = vmmov 0   ;;  %v3196_v1 = vld [vmem:[%s4137_s1 + $0x28] sm:$0xff]  ;;  %v3201_v2 = vld [vmem:[%s4137_s1 + $0x20] sm:$0xff] }
  0x35   :  { %2506 = vmatprep.subr.mxu0 %v3109_v0  ;;  %2518 = vmatprep.mubr.msk.f32.mxu0 %vm3110_vm0, %v3109_v0  ;;  %v3207_v3 = vld [vmem:[%s4137_s1 + $0x18] sm:$0xff]  ;;  %vm103_vm1 = vcmask 1041409   ;;  %v86_v4 = vld [vmem:[%s4136_s0] sm:$0x1]  ;;  %v87_v5 = vld [vmem:[%s4136_s0 + $0x8] sm:$0x1] }
  0x36   :  { %2521 = vmatprep.subr.mxu1 %v3109_v0  ;;  %2537 = vmatprep.mubr.msk.f32.mxu1 %vm3110_vm0, %v3109_v0  ;;  %v88_v6 = vld [vmem:[%s4136_s0 + $0x10] sm:$0x1]  ;;  %v89_v7 = vld [vmem:[%s4136_s0 + $0x18] sm:$0x1]  ;;  %v90_v8 = vld [vmem:[%s4136_s0 + $0x20] sm:$0x1] }
  0x37   :  { %2507 = vmatpush3.msra.mxu0 %v3196_v1  ;;  %v91_v9 = vld [vmem:[%s4136_s0 + $0x28] sm:$0x1]  ;;  %v3233_v10 = vld [vmem:[%s4137_s1 + $0x10] sm:$0xff]  ;;  %v102_v12 = vrot.slane %v87_v5, 7  ;;  %v105_v13 = vrot.slane %v88_v6, 6  ;;  %vm106_vm2 = vcmask 1042434  }
  0x38   :  { %2508 = vmatprep.subr.mxu0 %v3109_v0  ;;  %v92_v11 = vld [vmem:[%s4136_s0 + $0x30] sm:$0x1]  ;;  %v93_v14 = vld [vmem:[%s4136_s0 + $0x38] sm:$0x1]  ;;  %v108_v15 = vrot.slane %v89_v7, 5  ;;  %vm109_vm3 = vcmask 1043459  }
  0x39   :  { %2509 = vmatpush3.msra.mxu0 %v3201_v2  ;;  %v111_v16 = vrot.slane %v90_v8, 4  ;;  %v3246_v17 = vld [vmem:[%s4137_s1 + $0x8] sm:$0xff]  ;;  %v104_v18 = vsel %vm103_vm1, %v102_v12, %v86_v4  ;;  %vm112_vm4 = vcmask 1044484   ;;  %v114_v19 = vrot.slane %v91_v9, 3  ;;  %v3255_v22 = vld [vmem:[%s4137_s1] sm:$0xff]  ;;  %s3111_s23 = smov 64  }
  0x3a   :  { %2510 = vmatprep.subr.mxu0 %v3109_v0  ;;  %v107_v20 = vsel %vm106_vm2, %v105_v13, %v104_v18  ;;  %vm115_vm5 = vcmask 1045509   ;;  %v117_v21 = vrot.slane %v92_v11, 2  ;;  %vm118_vm6 = vcmask 1046534   ;;  %v3282_v30 = vld [vmem:[#allocation2] ss:$0 sm:$0xff]  ;;  %s3112_s24 = smov 32  }
  0x3b   :  { %2511 = vmatpush3.msra.mxu0 %v3207_v3  ;;  %v110_v23 = vsel %vm109_vm3, %v108_v15, %v107_v20  ;;  %v120_v24 = vrot.slane %v93_v14, 1  ;;  %vm121_vm7 = vcmask 1047559   ;;  %vm124_vm8 = vcmask 130048   ;;  %v3293_v44 = vld [vmem:[%s4139_s3 + $0x38] sm:$0xff]  ;;  %v3298_v45 = vld [vmem:[%s4139_s3 + $0x30] sm:$0xff]  ;;  %v3305_v46 = vld [vmem:[%s4139_s3 + $0x28] sm:$0xff] }
  0x3c   :  { %2512 = vmatprep.subr.mxu0 %v3109_v0  ;;  %v113_v25 = vsel %vm112_vm4, %v111_v16, %v110_v23  ;;  %vm139_vm9 = vcmask 392192   ;;  %2522 = vmatpush3.msra.mxu1 %v3293_v44  ;;  %v3312_v47 = vld [vmem:[%s4139_s3 + $0x20] sm:$0xff]  ;;  %v3319_v48 = vld [vmem:[%s4139_s3 + $0x18] sm:$0xff]  ;;  %v3326_v49 = vld [vmem:[%s4139_s3 + $0x10] sm:$0xff]  ;;  %s3113_s6 = smov 48   ;;  %vm241_vm10 = vcmask 261120  }
  0x3d   :  { %2513 = vmatpush3.msra.mxu0 %v3233_v10  ;;  %v116_v26 = vsel %vm115_vm5, %v114_v19, %v113_v25  ;;  %2523 = vmatprep.subr.mxu1 %v3109_v0  ;;  %v3333_v51 = vld [vmem:[%s4139_s3 + $0x8] sm:$0xff]  ;;  %v3343_v52 = vld [vmem:[%s4139_s3] sm:$0xff]  ;;  %v358_v56 = vld [vmem:[%s4136_s0 + $0x11] sm:$0x1]  ;;  %vm258_vm11 = vcmask 523264   ;;  %s3114_s2 = smov [#allocation10]  }
  0x3e   :  { %2514 = vmatprep.subr.mxu0 %v3109_v0  ;;  %v119_v27 = vsel %vm118_vm6, %v117_v21, %v116_v26  ;;  %2524 = vmatpush3.msra.mxu1 %v3298_v45  ;;  %v357_v55 = vld [vmem:[%s4136_s0 + $0x9] sm:$0x1]  ;;  %v356_v58 = vld [vmem:[%s4136_s0 + $0x1] sm:$0x1]  ;;  %v359_v59 = vld [vmem:[%s4136_s0 + $0x19] sm:$0x1] }
  0x3f   :  { %2515 = vmatpush3.msra.mxu0 %v3246_v17  ;;  %v122_v28 = vsel %vm121_vm7, %v120_v24, %v119_v27  ;;  %2525 = vmatprep.subr.mxu1 %v3109_v0  ;;  %v372_v57 = vrot.slane %v357_v55, 7  ;;  %v374_v60 = vrot.slane %v358_v56, 6  ;;  %v360_v62 = vld [vmem:[%s4136_s0 + $0x21] sm:$0x1]  ;;  %v376_v63 = vrot.slane %v359_v59, 5  ;;  %s2297_s18 = sshll.u32 %s3114_s2, 4  ;;  %s2298_s18 = int_to_ptr.vmem [resolvable:$true] %s2297_s18 }
  0x40   :  { %2516 = vmatprep.subr.mxu0 %v3109_v0  ;;  %v125_v29 = vsel %vm124_vm8, %v122_v28, 0.0  ;;  %2526 = vmatpush3.msra.mxu1 %v3305_v46  ;;  %v361_v5 = vld [vmem:[%s4136_s0 + $0x29] sm:$0x1]  ;;  %v378_v6 = vrot.slane %v360_v62, 4  ;;  %v362_v8 = vld [vmem:[%s4136_s0 + $0x31] sm:$0x1]  ;;  %p3082_p7 = scmp.lt.s32.totalorder %s2298_s18, %s2298_s18 }
  0x41   :  { %2517 = vmatpush3.msra.mxu0 %v3255_v22  ;;  %2527 = vmatprep.subr.mxu1 %v3109_v0  ;;  %v373_v61 = vsel %vm103_vm1, %v372_v57, %v356_v58  ;;  %v380_v9 = vrot.slane %v361_v5, 3  ;;  %v363_v12 = vld [vmem:[%s4136_s0 + $0x39] sm:$0x1]  ;;  %v382_v13 = vrot.slane %v362_v8, 2  ;;  %v3416_v24 = vld [vmem:[#allocation5] ss:$0 sm:$0xff] }
  0x42   :  { %2540 = vmatprep.subr.mxu0 %v3109_v0  ;;  %2519 = vmatmul.mubr.msk.f32.vlgmr.msra.gmra.mxu0 %vm139_vm9, %v125_v29  ;;  %v375_v4 = vsel %vm106_vm2, %v374_v60, %v373_v61  ;;  %v384_v15 = vrot.slane %v363_v12, 1  ;;  %vm2289_vm12 = vcmask 64512  }
  0x43   :  { %2541 = vmatpush3.msra.mxu0 %v3196_v1  ;;  %2552 = vmatprep.mubr.msk.f32.mxu0 %vm3110_vm0, %v3109_v0  ;;  %v377_v7 = vsel %vm109_vm3, %v376_v63, %v375_v4 }
  0x44   :  { %2542 = vmatprep.subr.mxu0 %v3109_v0  ;;  %2528 = vmatpush3.msra.mxu1 %v3312_v47  ;;  %v379_v11 = vsel %vm112_vm4, %v378_v6, %v377_v7  ;;  %v596_v7 = vld [vmem:[%s4136_s0 + $0x12] sm:$0x1] }
  0x45   :  { %2543 = vmatpush3.msra.mxu0 %v3201_v2  ;;  %2529 = vmatprep.subr.mxu1 %v3109_v0  ;;  %v381_v14 = vsel %vm115_vm5, %v380_v9, %v379_v11  ;;  %v594_v9 = vld [vmem:[%s4136_s0 + $0x2] sm:$0x1]  ;;  %v597_v11 = vld [vmem:[%s4136_s0 + $0x1a] sm:$0x1]  ;;  %v612_v12 = vrot.slane %v596_v7, 6 }
  0x46   :  { %2544 = vmatprep.subr.mxu0 %v3109_v0  ;;  %2530 = vmatpush3.msra.mxu1 %v3319_v48  ;;  %v383_v16 = vsel %vm118_vm6, %v382_v13, %v381_v14  ;;  %v598_v14 = vld [vmem:[%s4136_s0 + $0x22] sm:$0x1] }
  0x47   :  { %2545 = vmatpush3.msra.mxu0 %v3207_v3  ;;  %2531 = vmatprep.subr.mxu1 %v3109_v0  ;;  %v385_v18 = vsel %vm121_vm7, %v384_v15, %v383_v16  ;;  %v614_v15 = vrot.slane %v597_v11, 5 }
  0x48   :  { %2546 = vmatprep.subr.mxu0 %v3109_v0  ;;  %2532 = vmatpush3.msra.mxu1 %v3326_v49 }
  0x49   :  { %2547 = vmatpush3.msra.mxu0 %v3233_v10  ;;  %2533 = vmatprep.subr.mxu1 %v3109_v0 }
  0x4a   :  { %2548 = vmatprep.subr.mxu0 %v3109_v0  ;;  %2534 = vmatpush3.msra.mxu1 %v3333_v51 }
  0x4b   :  { %2549 = vmatpush3.msra.mxu0 %v3246_v17  ;;  %2535 = vmatprep.subr.mxu1 %v3109_v0 }
  0x4c   :  { %2550 = vmatprep.subr.mxu0 %v3109_v0  ;;  %2536 = vmatpush3.msra.mxu1 %v3343_v52 }
  0x4d   :  { %2551 = vmatpush3.msra.mxu0 %v3255_v22  ;;  %2555 = vmatprep.subr.mxu1 %v3109_v0 }
  0x4e   :  { %2574 = vmatprep.subr.mxu0 %v3109_v0 }
 0x102   :  { %v209_v31 = vpop.f32.mrf.mxu0 }
 0x103   :  { %v210_v32 = vadd.f32 %v3282_v30, %v209_v31 }
 0x104   :  { %v2520_v33 = vpop.f32.mrf.mxu0 }
 0x105   :  { %2853 = vtanh.f32 %v210_v32  ;;  %v2310_v35 = vmul.f32 -1.442695, %v210_v32 }
 0x107   :  { %2855 = vpow2.f32 %v2310_v35 }
 0x112   :  { %v2854_v34 = vpop.eup %2853 }
 0x113   :  { %222 = vrot.lane.b32.xlu0 %v2854_v34, %s3111_s23 }
 0x114   :  { %v2856_v36 = vpop.eup %2855 }
 0x115   :  { %v216_v37 = vadd.f32 1.0, %v2856_v36 }
 0x117   :  { %2857 = vrcp.f32 %v216_v37 }
 0x124   :  { %v2858_v38 = vpop.eup %2857 }
 0x125   :  { %v220_v41 = vmul.f32 0.0, %v2858_v38 }
 0x185   :  { %v223_v39 = vpop.permute.xlu0 %222 }
 0x186   :  { %v225_v40 = vmul.f32 %v2858_v38, %v223_v39 }
 0x188   :  { %227 = vrot.lane.b32.xlu0 %v225_v40, %s3112_s24 }
 0x1fa   :  { %v228_v42 = vpop.permute.xlu0 %227 }
 0x1fb   :  { %v3287_v43 = vadd.f32 %v228_v42, %v220_v41 }
 0x1fd   :  { %2859 = vtanh.f32 %v3287_v43 }
 0x20a   :  { %v2860_v50 = vpop.eup %2859 }
 0x20b   :  { %233 = vrot.lane.b32.xlu1 %v2860_v50, %s3111_s23 }
 0x27d   :  { %v234_v53 = vpop.permute.xlu1 %233 }
 0x27e   :  { %v236_v54 = vmul.f32 %v2858_v38, %v234_v53 }
 0x280   :  { %387 = vrot.lane.b32.xlu0 %v236_v54, %s3113_s6  ;;  %238 = vrot.lane.b32.xlu1 %v236_v54, %s3112_s24 }
 0x2f2   :  { %v388_v19 = vpop.permute.xlu0 %387  ;;  %v239_v20 = vpop.permute.xlu1 %238 }
 0x2f3   :  { %v390_v21 = vsel %vm124_vm8, %v385_v18, %v388_v19  ;;  %v242_v23 = vsel %vm241_vm10, %v239_v20, 0.0  ;;  %v599_v18 = vld [vmem:[%s4136_s0 + $0x2a] sm:$0x1]  ;;  %v616_v19 = vrot.slane %v598_v14, 4 }
 0x2f4   :  { %2538 = vmatmul.mubr.msk.f32.vlgmr.msra.gmra.mxu1 %vm258_vm11, %v242_v23  ;;  %2553 = vmatmul.mubr.msk.f32.vlgmr.msra.gmra.mxu0 %vm139_vm9, %v390_v21  ;;  %v600_v21 = vld [vmem:[%s4136_s0 + $0x32] sm:$0x1]  ;;  %v618_v23 = vrot.slane %v599_v18, 3 }
 0x2f5   :  { %2556 = vmatpush3.msra.mxu1 %v3293_v44  ;;  %2575 = vmatpush3.msra.mxu0 %v3196_v1 }
 0x2f6   :  { %2557 = vmatprep.subr.mxu1 %v3109_v0  ;;  %2576 = vmatprep.subr.mxu0 %v3109_v0 }
 0x2f7   :  { %2558 = vmatpush3.msra.mxu1 %v3298_v45  ;;  %2577 = vmatpush3.msra.mxu0 %v3201_v2 }
 0x2f8   :  { %2559 = vmatprep.subr.mxu1 %v3109_v0  ;;  %2578 = vmatprep.subr.mxu0 %v3109_v0 }
 0x2f9   :  { %2560 = vmatpush3.msra.mxu1 %v3305_v46  ;;  %2579 = vmatpush3.msra.mxu0 %v3207_v3 }
 0x2fa   :  { %2561 = vmatprep.subr.mxu1 %v3109_v0  ;;  %2580 = vmatprep.subr.mxu0 %v3109_v0 }
 0x2fb   :  { %2562 = vmatpush3.msra.mxu1 %v3312_v47  ;;  %2571 = vmatprep.mubr.msk.f32.mxu1 %vm3110_vm0, %v3109_v0 }
 0x2fc   :  { %2563 = vmatprep.subr.mxu1 %v3109_v0  ;;  %2581 = vmatpush3.msra.mxu0 %v3233_v10 }
 0x2fd   :  { %2564 = vmatpush3.msra.mxu1 %v3319_v48  ;;  %2582 = vmatprep.subr.mxu0 %v3109_v0 }
 0x2fe   :  { %2565 = vmatprep.subr.mxu1 %v3109_v0  ;;  %2583 = vmatpush3.msra.mxu0 %v3246_v17 }
 0x2ff   :  { %2566 = vmatpush3.msra.mxu1 %v3326_v49  ;;  %2584 = vmatprep.subr.mxu0 %v3109_v0 }
 0x300   :  { %2567 = vmatprep.subr.mxu1 %v3109_v0  ;;  %2585 = vmatpush3.msra.mxu0 %v3255_v22 }
 0x301   :  { %2568 = vmatpush3.msra.mxu1 %v3333_v51  ;;  %2586 = vmatprep.mubr.msk.f32.mxu0 %vm3110_vm0, %v3109_v0 }
 0x302   :  { %2569 = vmatprep.subr.mxu1 %v3109_v0  ;;  %2608 = vmatprep.subr.mxu0 %v3109_v0 }
 0x303   :  { %2570 = vmatpush3.msra.mxu1 %v3343_v52 }
 0x304   :  { %2589 = vmatprep.subr.mxu1 %v3109_v0 }
 0x3b4   :  { %v328_v25 = vpop.f32.mrf.mxu1  ;;  %v460_v26 = vpop.f32.mrf.mxu0 }
 0x3b5   :  { %v329_v27 = vadd.f32 %v3416_v24, %v328_v25  ;;  %v461_v28 = vadd.f32 %v3282_v30, %v460_v26  ;;  %v601_v26 = vld [vmem:[%s4136_s0 + $0x3a] sm:$0x1] }
 0x3b6   :  { %v2539_v29 = vpop.f32.mrf.mxu1  ;;  %v2554_v31 = vpop.f32.mrf.mxu0 }
 0x3b7   :  { %2861 = vtanh.f32 %v329_v27  ;;  %v2313_v34 = vmul.f32 -1.442695, %v329_v27  ;;  %v2315_v35 = vmul.f32 -1.442695, %v461_v28  ;;  %v620_v27 = vrot.slane %v600_v21, 2 }
 0x3b8   :  { %2863 = vtanh.f32 %v461_v28  ;;  %v622_v29 = vrot.slane %v601_v26, 1  ;;  %v834_v21 = vld [vmem:[%s4136_s0 + $0x13] sm:$0x1]  ;;  %v835_v26 = vld [vmem:[%s4136_s0 + $0x1b] sm:$0x1] }
 0x3b9   :  { %2865 = vpow2.f32 %v2313_v34 }
 0x3ba   :  { %2867 = vpow2.f32 %v2315_v35 }
 0x3c4   :  { %v2862_v32 = vpop.eup %2861 }
 0x3c5   :  { %v2864_v33 = vpop.eup %2863  ;;  %341 = vrot.lane.b32.xlu1 %v2862_v32, %s3111_s23 }
 0x3c6   :  { %473 = vrot.lane.b32.xlu0 %v2864_v33, %s3111_s23  ;;  %v2866_v36 = vpop.eup %2865 }
 0x3c7   :  { %v2868_v37 = vpop.eup %2867  ;;  %v335_v38 = vadd.f32 1.0, %v2866_v36 }
 0x3c8   :  { %v467_v39 = vadd.f32 1.0, %v2868_v37 }
 0x3c9   :  { %2869 = vrcp.f32 %v335_v38 }
 0x3ca   :  { %2871 = vrcp.f32 %v467_v39 }
 0x3d6   :  { %v2870_v40 = vpop.eup %2869 }
 0x3d7   :  { %v2872_v42 = vpop.eup %2871  ;;  %v339_v55 = vmul.f32 0.0, %v2870_v40 }
 0x3d8   :  { %v471_v57 = vmul.f32 %v2872_v42, %v3287_v43  ;;  %v595_v43 = vld [vmem:[%s4136_s0 + $0xa] sm:$0x1] }
 0x3d9   :  { %v610_v8 = vrot.slane %v595_v43, 7 }
 0x3db   :  { %v611_v13 = vsel %vm103_vm1, %v610_v8, %v594_v9 }
 0x3dc   :  { %v613_v16 = vsel %vm106_vm2, %v612_v12, %v611_v13 }
 0x3dd   :  { %v615_v20 = vsel %vm109_vm3, %v614_v15, %v613_v16 }
 0x3de   :  { %v617_v25 = vsel %vm112_vm4, %v616_v19, %v615_v20 }
 0x3df   :  { %v619_v28 = vsel %vm115_vm5, %v618_v23, %v617_v25  ;;  %v832_v25 = vld [vmem:[%s4136_s0 + $0x3] sm:$0x1] }
 0x3e0   :  { %v621_v32 = vsel %vm118_vm6, %v620_v27, %v619_v28  ;;  %v850_v27 = vrot.slane %v834_v21, 6 }
 0x3e1   :  { %v623_v35 = vsel %vm121_vm7, %v622_v29, %v621_v32  ;;  %v836_v29 = vld [vmem:[%s4136_s0 + $0x23] sm:$0x1] }
 0x437   :  { %v342_v41 = vpop.permute.xlu1 %341 }
 0x438   :  { %v344_v50 = vmul.f32 %v2870_v40, %v342_v41  ;;  %v474_v53 = vpop.permute.xlu0 %473 }
 0x439   :  { %v476_v54 = vmul.f32 %v2872_v42, %v474_v53 }
 0x43a   :  { %346 = vrot.lane.b32.xlu1 %v344_v50, %s3112_s24 }
 0x43b   :  { %478 = vrot.lane.b32.xlu0 %v476_v54, %s3112_s24 }
 0x4ac   :  { %v347_v56 = vpop.permute.xlu1 %346 }
 0x4ad   :  { %v3425_v58 = vadd.f32 %v347_v56, %v339_v55  ;;  %v479_v59 = vpop.permute.xlu0 %478 }
 0x4ae   :  { %v3427_v60 = vadd.f32 %v479_v59, %v471_v57 }
 0x4af   :  { %2873 = vtanh.f32 %v3425_v58 }
 0x4b0   :  { %2875 = vtanh.f32 %v3427_v60 }
 0x4bc   :  { %v2874_v61 = vpop.eup %2873 }
 0x4bd   :  { %v2876_v62 = vpop.eup %2875  ;;  %352 = vrot.lane.b32.xlu1 %v2874_v61, %s3111_s23 }
 0x4be   :  { %484 = vrot.lane.b32.xlu0 %v2876_v62, %s3111_s23 }
 0x52f   :  { %v353_v63 = vpop.permute.xlu1 %352 }
 0x530   :  { %v355_v4 = vmul.f32 %v2870_v40, %v353_v63  ;;  %v485_v5 = vpop.permute.xlu0 %484 }
 0x531   :  { %v487_v6 = vmul.f32 %v2872_v42, %v485_v5 }
 0x532   :  { %493 = vrot.lane.b32.xlu0 %v355_v4, %s3111_s23 }
 0x533   :  { %489 = vrot.lane.b32.xlu1 %v487_v6, %s3112_s24 }
 0x537   :  { %625 = vrot.lane.b32.xlu1 %v487_v6, %s3113_s6 }
 0x5a4   :  { %v494_v31 = vpop.permute.xlu0 %493 }
 0x5a5   :  { %v490_v33 = vpop.permute.xlu1 %489 }
 0x5a6   :  { %v496_v34 = vsel %vm241_vm10, %v490_v33, %v494_v31  ;;  %v852_v31 = vrot.slane %v835_v26, 5  ;;  %v837_v33 = vld [vmem:[%s4136_s0 + $0x2b] sm:$0x1] }
 0x5a7   :  { %2572 = vmatmul.mubr.msk.f32.vlgmr.msra.gmra.mxu1 %vm258_vm11, %v496_v34  ;;  %v854_v34 = vrot.slane %v836_v29, 4 }
 0x5a8   :  { %2590 = vmatpush3.msra.mxu1 %v3293_v44  ;;  %2605 = vmatprep.mubr.msk.f32.mxu1 %vm3110_vm0, %v3109_v0 }
 0x5a9   :  { %v626_v36 = vpop.permute.xlu1 %625  ;;  %2591 = vmatprep.subr.mxu1 %v3109_v0 }
 0x5aa   :  { %v628_v37 = vsel %vm124_vm8, %v623_v35, %v626_v36  ;;  %2592 = vmatpush3.msra.mxu1 %v3298_v45  ;;  %v838_v36 = vld [vmem:[%s4136_s0 + $0x33] sm:$0x1] }
 0x5ab   :  { %2587 = vmatmul.mubr.msk.f32.vlgmr.msra.gmra.mxu0 %vm139_vm9, %v628_v37  ;;  %2593 = vmatprep.subr.mxu1 %v3109_v0  ;;  %v856_v37 = vrot.slane %v837_v33, 3 }
 0x5ac   :  { %2594 = vmatpush3.msra.mxu1 %v3305_v46  ;;  %2609 = vmatpush3.msra.mxu0 %v3196_v1 }
 0x5ad   :  { %2595 = vmatprep.subr.mxu1 %v3109_v0  ;;  %2610 = vmatprep.subr.mxu0 %v3109_v0 }
 0x5ae   :  { %2596 = vmatpush3.msra.mxu1 %v3312_v47  ;;  %2611 = vmatpush3.msra.mxu0 %v3201_v2 }
 0x5af   :  { %2597 = vmatprep.subr.mxu1 %v3109_v0  ;;  %2612 = vmatprep.subr.mxu0 %v3109_v0 }
 0x5b0   :  { %2598 = vmatpush3.msra.mxu1 %v3319_v48  ;;  %2613 = vmatpush3.msra.mxu0 %v3207_v3 }
 0x5b1   :  { %2599 = vmatprep.subr.mxu1 %v3109_v0  ;;  %2614 = vmatprep.subr.mxu0 %v3109_v0 }
 0x5b2   :  { %2600 = vmatpush3.msra.mxu1 %v3326_v49  ;;  %2615 = vmatpush3.msra.mxu0 %v3233_v10 }
 0x5b3   :  { %2601 = vmatprep.subr.mxu1 %v3109_v0  ;;  %2616 = vmatprep.subr.mxu0 %v3109_v0 }
 0x5b4   :  { %2602 = vmatpush3.msra.mxu1 %v3333_v51  ;;  %2617 = vmatpush3.msra.mxu0 %v3246_v17 }
 0x5b5   :  { %2603 = vmatprep.subr.mxu1 %v3109_v0  ;;  %2618 = vmatprep.subr.mxu0 %v3109_v0 }
 0x5b6   :  { %2604 = vmatpush3.msra.mxu1 %v3343_v52  ;;  %2619 = vmatpush3.msra.mxu0 %v3255_v22 }
 0x5b7   :  { %2620 = vmatprep.mubr.msk.f32.mxu0 %vm3110_vm0, %v3109_v0  ;;  %2623 = vmatprep.subr.mxu0 %v3109_v0 }
 0x5b8   :  { %2642 = vmatprep.subr.mxu1 %v3109_v0 }
 0x667   :  { %v566_v38 = vpop.f32.mrf.mxu1 }
 0x668   :  { %v567_v39 = vadd.f32 %v3416_v24, %v566_v38 }
 0x669   :  { %v2573_v40 = vpop.f32.mrf.mxu1 }
 0x66a   :  { %2877 = vtanh.f32 %v567_v39  ;;  %v2317_v55 = vmul.f32 -1.442695, %v567_v39  ;;  %v839_v39 = vld [vmem:[%s4136_s0 + $0x3b] sm:$0x1]  ;;  %v858_v40 = vrot.slane %v838_v36, 2 }
 0x66b   :  { %v698_v41 = vpop.f32.mrf.mxu0  ;;  %v1072_v36 = vld [vmem:[%s4136_s0 + $0x14] sm:$0x1] }
 0x66c   :  { %v699_v42 = vadd.f32 %v3282_v30, %v698_v41 }
 0x66d   :  { %v2588_v50 = vpop.f32.mrf.mxu0 }
 0x66e   :  { %2879 = vtanh.f32 %v699_v42  ;;  %v2319_v56 = vmul.f32 -1.442695, %v699_v42  ;;  %v860_v42 = vrot.slane %v839_v39, 1  ;;  %v1073_v39 = vld [vmem:[%s4136_s0 + $0x1c] sm:$0x1] }
 0x66f   :  { %2881 = vpow2.f32 %v2317_v55 }
 0x670   :  { %2883 = vpow2.f32 %v2319_v56 }
 0x677   :  { %v2878_v53 = vpop.eup %2877 }
 0x678   :  { %579 = vrot.lane.b32.xlu0 %v2878_v53, %s3111_s23 }
 0x67b   :  { %v2880_v54 = vpop.eup %2879 }
 0x67c   :  { %711 = vrot.lane.b32.xlu1 %v2880_v54, %s3111_s23  ;;  %v2882_v57 = vpop.eup %2881 }
 0x67d   :  { %v573_v59 = vadd.f32 1.0, %v2882_v57  ;;  %v2884_v61 = vpop.eup %2883 }
 0x67e   :  { %v705_v62 = vadd.f32 1.0, %v2884_v61 }
 0x67f   :  { %2885 = vrcp.f32 %v573_v59 }
 0x680   :  { %2887 = vrcp.f32 %v705_v62 }
 0x68c   :  { %v2886_v63 = vpop.eup %2885 }
 0x68d   :  { %v2888_v6 = vpop.eup %2887  ;;  %v577_v8 = vmul.f32 %v2886_v63, %v3425_v58 }
 0x68e   :  { %v709_v12 = vmul.f32 %v2888_v6, %v3427_v60  ;;  %v833_v60 = vld [vmem:[%s4136_s0 + $0xb] sm:$0x1] }
 0x68f   :  { %v848_v23 = vrot.slane %v833_v60, 7 }
 0x691   :  { %v849_v28 = vsel %vm103_vm1, %v848_v23, %v832_v25 }
 0x692   :  { %v851_v32 = vsel %vm106_vm2, %v850_v27, %v849_v28 }
 0x693   :  { %v853_v35 = vsel %vm109_vm3, %v852_v31, %v851_v32 }
 0x694   :  { %v855_v38 = vsel %vm112_vm4, %v854_v34, %v853_v35 }
 0x695   :  { %v857_v41 = vsel %vm115_vm5, %v856_v37, %v855_v38  ;;  %v1070_v38 = vld [vmem:[%s4136_s0 + $0x4] sm:$0x1] }
 0x696   :  { %v859_v50 = vsel %vm118_vm6, %v858_v40, %v857_v41  ;;  %v1088_v40 = vrot.slane %v1072_v36, 6 }
 0x697   :  { %v861_v56 = vsel %vm121_vm7, %v860_v42, %v859_v50  ;;  %v1074_v42 = vld [vmem:[%s4136_s0 + $0x24] sm:$0x1]  ;;  %v1090_v50 = vrot.slane %v1073_v39, 5 }
 0x6ea   :  { %v580_v4 = vpop.permute.xlu0 %579 }
 0x6eb   :  { %v582_v5 = vmul.f32 %v2886_v63, %v580_v4 }
 0x6ed   :  { %584 = vrot.lane.b32.xlu0 %v582_v5, %s3112_s24 }
 0x6ee   :  { %v712_v43 = vpop.permute.xlu1 %711 }
 0x6ef   :  { %v714_v7 = vmul.f32 %v2888_v6, %v712_v43 }
 0x6f1   :  { %716 = vrot.lane.b32.xlu1 %v714_v7, %s3112_s24 }
 0x75f   :  { %v585_v9 = vpop.permute.xlu0 %584 }
 0x760   :  { %v3510_v11 = vadd.f32 %v585_v9, %v577_v8 }
 0x762   :  { %2889 = vtanh.f32 %v3510_v11 }
 0x763   :  { %v717_v13 = vpop.permute.xlu1 %716 }
 0x764   :  { %v3514_v14 = vadd.f32 %v717_v13, %v709_v12 }
 0x766   :  { %2891 = vtanh.f32 %v3514_v14 }
 0x76f   :  { %v2890_v15 = vpop.eup %2889 }
 0x770   :  { %590 = vrot.lane.b32.xlu0 %v2890_v15, %s3111_s23 }
 0x773   :  { %v2892_v16 = vpop.eup %2891 }
 0x774   :  { %722 = vrot.lane.b32.xlu1 %v2892_v16, %s3111_s23 }
 0x7e2   :  { %v591_v18 = vpop.permute.xlu0 %590 }
 0x7e3   :  { %v593_v58 = vmul.f32 %v2886_v63, %v591_v18 }
 0x7e5   :  { %731 = vrot.lane.b32.xlu1 %v593_v58, %s3111_s23 }
 0x7e6   :  { %v723_v19 = vpop.permute.xlu1 %722 }
 0x7e7   :  { %v725_v20 = vmul.f32 %v2888_v6, %v723_v19 }
 0x7e9   :  { %727 = vrot.lane.b32.xlu0 %v725_v20, %s3112_s24 }
 0x7ed   :  { %863 = vrot.lane.b32.xlu0 %v725_v20, %s3113_s6 }
 0x857   :  { %v732_v53 = vpop.permute.xlu1 %731 }
 0x85b   :  { %v728_v54 = vpop.permute.xlu0 %727 }
 0x85c   :  { %v734_v55 = vsel %vm241_vm10, %v728_v54, %v732_v53  ;;  %v1075_v54 = vld [vmem:[%s4136_s0 + $0x2c] sm:$0x1] }
 0x85d   :  { %2606 = vmatmul.mubr.msk.f32.vlgmr.msra.gmra.mxu1 %vm258_vm11, %v734_v55  ;;  %v1092_v55 = vrot.slane %v1074_v42, 4 }
 0x85e   :  { %2643 = vmatpush3.msra.mxu1 %v3196_v1  ;;  %2654 = vmatprep.mubr.msk.f32.mxu1 %vm3110_vm0, %v3109_v0 }
 0x85f   :  { %v864_v57 = vpop.permute.xlu0 %863  ;;  %2644 = vmatprep.subr.mxu1 %v3109_v0 }
 0x860   :  { %v866_v59 = vsel %vm124_vm8, %v861_v56, %v864_v57  ;;  %2645 = vmatpush3.msra.mxu1 %v3201_v2  ;;  %v1076_v57 = vld [vmem:[%s4136_s0 + $0x34] sm:$0x1] }
 0x861   :  { %2621 = vmatmul.mubr.msk.f32.vlgmr.msra.gmra.mxu0 %vm139_vm9, %v866_v59  ;;  %2646 = vmatprep.subr.mxu1 %v3109_v0  ;;  %v1094_v59 = vrot.slane %v1075_v54, 3 }
 0x862   :  { %2624 = vmatpush3.msra.mxu0 %v3293_v44  ;;  %2647 = vmatpush3.msra.mxu1 %v3207_v3 }
 0x863   :  { %2625 = vmatprep.subr.mxu0 %v3109_v0  ;;  %2648 = vmatprep.subr.mxu1 %v3109_v0 }
 0x864   :  { %2626 = vmatpush3.msra.mxu0 %v3298_v45  ;;  %2639 = vmatprep.mubr.msk.f32.mxu0 %vm3110_vm0, %v3109_v0 }
 0x865   :  { %2627 = vmatprep.subr.mxu0 %v3109_v0  ;;  %2649 = vmatpush3.msra.mxu1 %v3233_v10 }
 0x866   :  { %2628 = vmatpush3.msra.mxu0 %v3305_v46  ;;  %2650 = vmatprep.subr.mxu1 %v3109_v0 }
 0x867   :  { %2629 = vmatprep.subr.mxu0 %v3109_v0  ;;  %2651 = vmatpush3.msra.mxu1 %v3246_v17 }
 0x868   :  { %2630 = vmatpush3.msra.mxu0 %v3312_v47  ;;  %2652 = vmatprep.subr.mxu1 %v3109_v0 }
 0x869   :  { %2631 = vmatprep.subr.mxu0 %v3109_v0  ;;  %2653 = vmatpush3.msra.mxu1 %v3255_v22 }
 0x86a   :  { %2632 = vmatpush3.msra.mxu0 %v3319_v48  ;;  %2657 = vmatprep.subr.mxu1 %v3109_v0 }
 0x86b   :  { %2633 = vmatprep.subr.mxu0 %v3109_v0 }
 0x86c   :  { %2634 = vmatpush3.msra.mxu0 %v3326_v49 }
 0x86d   :  { %2635 = vmatprep.subr.mxu0 %v3109_v0 }
 0x86e   :  { %2636 = vmatpush3.msra.mxu0 %v3333_v51 }
 0x86f   :  { %2637 = vmatprep.subr.mxu0 %v3109_v0 }
 0x870   :  { %2638 = vmatpush3.msra.mxu0 %v3343_v52 }
 0x871   :  { %2676 = vmatprep.subr.mxu0 %v3109_v0 }
 0x91d   :  { %v804_v61 = vpop.f32.mrf.mxu1 }
 0x91e   :  { %v805_v62 = vadd.f32 %v3416_v24, %v804_v61 }
 0x91f   :  { %v2607_v63 = vpop.f32.mrf.mxu1 }
 0x920   :  { %2893 = vtanh.f32 %v805_v62  ;;  %v2321_v8 = vmul.f32 -1.442695, %v805_v62  ;;  %v1077_v62 = vld [vmem:[%s4136_s0 + $0x3c] sm:$0x1]  ;;  %v1096_v63 = vrot.slane %v1076_v57, 2 }
 0x921   :  { %v936_v4 = vpop.f32.mrf.mxu0 }
 0x922   :  { %v937_v5 = vadd.f32 %v3282_v30, %v936_v4 }
 0x923   :  { %v2622_v6 = vpop.f32.mrf.mxu0 }
 0x924   :  { %2895 = vtanh.f32 %v937_v5  ;;  %v2323_v9 = vmul.f32 -1.442695, %v937_v5  ;;  %v1098_v5 = vrot.slane %v1077_v62, 1 }
 0x925   :  { %2897 = vpow2.f32 %v2321_v8 }
 0x926   :  { %2899 = vpow2.f32 %v2323_v9 }
 0x92d   :  { %v2894_v43 = vpop.eup %2893 }
 0x92e   :  { %817 = vrot.lane.b32.xlu1 %v2894_v43, %s3111_s23 }
 0x931   :  { %v2896_v7 = vpop.eup %2895 }
 0x932   :  { %949 = vrot.lane.b32.xlu0 %v2896_v7, %s3111_s23  ;;  %v2898_v12 = vpop.eup %2897 }
 0x933   :  { %v811_v13 = vadd.f32 1.0, %v2898_v12  ;;  %v2900_v15 = vpop.eup %2899 }
 0x934   :  { %v943_v16 = vadd.f32 1.0, %v2900_v15 }
 0x935   :  { %2901 = vrcp.f32 %v811_v13 }
 0x936   :  { %2903 = vrcp.f32 %v943_v16 }
 0x942   :  { %v2902_v18 = vpop.eup %2901 }
 0x943   :  { %v2904_v20 = vpop.eup %2903  ;;  %v815_v23 = vmul.f32 %v2902_v18, %v3510_v11 }
 0x944   :  { %v947_v27 = vmul.f32 %v2904_v20, %v3514_v14  ;;  %v1071_v14 = vld [vmem:[%s4136_s0 + $0xc] sm:$0x1] }
 0x945   :  { %v1086_v37 = vrot.slane %v1071_v14, 7 }
 0x947   :  { %v1087_v41 = vsel %vm103_vm1, %v1086_v37, %v1070_v38 }
 0x948   :  { %v1089_v53 = vsel %vm106_vm2, %v1088_v40, %v1087_v41  ;;  %v1310_v41 = vld [vmem:[%s4136_s0 + $0x15] sm:$0x1] }
 0x949   :  { %v1091_v56 = vsel %vm109_vm3, %v1090_v50, %v1089_v53  ;;  %v1308_v50 = vld [vmem:[%s4136_s0 + $0x5] sm:$0x1]  ;;  %v1311_v53 = vld [vmem:[%s4136_s0 + $0x1d] sm:$0x1]  ;;  %v1326_v54 = vrot.slane %v1310_v41, 6 }
 0x94a   :  { %v1093_v61 = vsel %vm112_vm4, %v1092_v55, %v1091_v56  ;;  %v1312_v56 = vld [vmem:[%s4136_s0 + $0x25] sm:$0x1]  ;;  %v1328_v57 = vrot.slane %v1311_v53, 5  ;;  %v1548_v53 = vld [vmem:[%s4136_s0 + $0x16] sm:$0x1] }
 0x94b   :  { %v1095_v4 = vsel %vm115_vm5, %v1094_v59, %v1093_v61  ;;  %v1313_v61 = vld [vmem:[%s4136_s0 + $0x2d] sm:$0x1]  ;;  %v1330_v62 = vrot.slane %v1312_v56, 4  ;;  %v1549_v56 = vld [vmem:[%s4136_s0 + $0x1e] sm:$0x1] }
 0x94c   :  { %v1097_v6 = vsel %vm118_vm6, %v1096_v63, %v1095_v4  ;;  %v1314_v4 = vld [vmem:[%s4136_s0 + $0x35] sm:$0x1] }
 0x94d   :  { %v1099_v9 = vsel %vm121_vm7, %v1098_v5, %v1097_v6  ;;  %v1332_v5 = vrot.slane %v1313_v61, 3  ;;  %v1550_v61 = vld [vmem:[%s4136_s0 + $0x26] sm:$0x1] }
 0x9a0   :  { %v818_v58 = vpop.permute.xlu1 %817 }
 0x9a1   :  { %v820_v19 = vmul.f32 %v2902_v18, %v818_v58 }
 0x9a3   :  { %822 = vrot.lane.b32.xlu1 %v820_v19, %s3112_s24 }
 0x9a4   :  { %v950_v60 = vpop.permute.xlu0 %949 }
 0x9a5   :  { %v952_v21 = vmul.f32 %v2904_v20, %v950_v60 }
 0x9a7   :  { %954 = vrot.lane.b32.xlu0 %v952_v21, %s3112_s24 }
 0xa15   :  { %v823_v25 = vpop.permute.xlu1 %822 }
 0xa16   :  { %v3596_v26 = vadd.f32 %v823_v25, %v815_v23 }
 0xa18   :  { %2905 = vtanh.f32 %v3596_v26 }
 0xa19   :  { %v955_v28 = vpop.permute.xlu0 %954 }
 0xa1a   :  { %v3600_v29 = vadd.f32 %v955_v28, %v947_v27 }
 0xa1c   :  { %2907 = vtanh.f32 %v3600_v29 }
 0xa25   :  { %v2906_v31 = vpop.eup %2905 }
 0xa26   :  { %828 = vrot.lane.b32.xlu1 %v2906_v31, %s3111_s23 }
 0xa29   :  { %v2908_v32 = vpop.eup %2907 }
 0xa2a   :  { %960 = vrot.lane.b32.xlu0 %v2908_v32, %s3111_s23 }
 0xa98   :  { %v829_v33 = vpop.permute.xlu1 %828 }
 0xa99   :  { %v831_v11 = vmul.f32 %v2902_v18, %v829_v33 }
 0xa9b   :  { %969 = vrot.lane.b32.xlu0 %v831_v11, %s3111_s23 }
 0xa9c   :  { %v961_v34 = vpop.permute.xlu0 %960 }
 0xa9d   :  { %v963_v35 = vmul.f32 %v2904_v20, %v961_v34 }
 0xa9f   :  { %965 = vrot.lane.b32.xlu1 %v963_v35, %s3112_s24 }
 0xaa3   :  { %1101 = vrot.lane.b32.xlu1 %v963_v35, %s3113_s6 }
 0xb0d   :  { %v970_v43 = vpop.permute.xlu0 %969 }
 0xb11   :  { %v966_v7 = vpop.permute.xlu1 %965 }
 0xb12   :  { %v972_v8 = vsel %vm241_vm10, %v966_v7, %v970_v43  ;;  %v1315_v43 = vld [vmem:[%s4136_s0 + $0x3d] sm:$0x1]  ;;  %v1334_v7 = vrot.slane %v1314_v4, 2  ;;  %v1551_v4 = vld [vmem:[%s4136_s0 + $0x2e] sm:$0x1] }
 0xb13   :  { %2640 = vmatmul.mubr.msk.f32.vlgmr.msra.gmra.mxu0 %vm258_vm11, %v972_v8 }
 0xb14   :  { %2677 = vmatpush3.msra.mxu0 %v3196_v1  ;;  %2688 = vmatprep.mubr.msk.f32.mxu0 %vm3110_vm0, %v3109_v0 }
 0xb15   :  { %v1102_v12 = vpop.permute.xlu1 %1101  ;;  %2678 = vmatprep.subr.mxu0 %v3109_v0 }
 0xb16   :  { %v1104_v13 = vsel %vm124_vm8, %v1099_v9, %v1102_v12  ;;  %2679 = vmatpush3.msra.mxu0 %v3201_v2  ;;  %v1336_v9 = vrot.slane %v1315_v43, 1  ;;  %v1552_v43 = vld [vmem:[%s4136_s0 + $0x36] sm:$0x1] }
 0xb17   :  { %2655 = vmatmul.mubr.msk.f32.vlgmr.msra.gmra.mxu1 %vm139_vm9, %v1104_v13  ;;  %2680 = vmatprep.subr.mxu0 %v3109_v0 }
 0xb18   :  { %2658 = vmatpush3.msra.mxu1 %v3293_v44  ;;  %2681 = vmatpush3.msra.mxu0 %v3207_v3 }
 0xb19   :  { %2659 = vmatprep.subr.mxu1 %v3109_v0  ;;  %2682 = vmatprep.subr.mxu0 %v3109_v0 }
 0xb1a   :  { %2660 = vmatpush3.msra.mxu1 %v3298_v45  ;;  %2673 = vmatprep.mubr.msk.f32.mxu1 %vm3110_vm0, %v3109_v0 }
 0xb1b   :  { %2661 = vmatprep.subr.mxu1 %v3109_v0  ;;  %2683 = vmatpush3.msra.mxu0 %v3233_v10 }
 0xb1c   :  { %2662 = vmatpush3.msra.mxu1 %v3305_v46  ;;  %2684 = vmatprep.subr.mxu0 %v3109_v0 }
 0xb1d   :  { %2663 = vmatprep.subr.mxu1 %v3109_v0  ;;  %2685 = vmatpush3.msra.mxu0 %v3246_v17 }
 0xb1e   :  { %2664 = vmatpush3.msra.mxu1 %v3312_v47  ;;  %2686 = vmatprep.subr.mxu0 %v3109_v0 }
 0xb1f   :  { %2665 = vmatprep.subr.mxu1 %v3109_v0  ;;  %2687 = vmatpush3.msra.mxu0 %v3255_v22 }
 0xb20   :  { %2666 = vmatpush3.msra.mxu1 %v3319_v48  ;;  %2691 = vmatprep.subr.mxu0 %v3109_v0 }
 0xb21   :  { %2667 = vmatprep.subr.mxu1 %v3109_v0 }
 0xb22   :  { %2668 = vmatpush3.msra.mxu1 %v3326_v49 }
 0xb23   :  { %2669 = vmatprep.subr.mxu1 %v3109_v0 }
 0xb24   :  { %2670 = vmatpush3.msra.mxu1 %v3333_v51 }
 0xb25   :  { %2671 = vmatprep.subr.mxu1 %v3109_v0 }
 0xb26   :  { %2672 = vmatpush3.msra.mxu1 %v3343_v52 }
 0xb27   :  { %2710 = vmatprep.subr.mxu1 %v3109_v0 }
 0xbd3   :  { %v1042_v1 = vpop.f32.mrf.mxu0 }
 0xbd4   :  { %v1043_v2 = vadd.f32 %v3416_v24, %v1042_v1 }
 0xbd5   :  { %v2641_v3 = vpop.f32.mrf.mxu0 }
 0xbd6   :  { %2909 = vtanh.f32 %v1043_v2  ;;  %v2325_v18 = vmul.f32 -1.442695, %v1043_v2 }
 0xbd7   :  { %v1174_v10 = vpop.f32.mrf.mxu1 }
 0xbd8   :  { %v1175_v17 = vadd.f32 %v3282_v30, %v1174_v10  ;;  %v3730_v10 = vld [vmem:[%s4137_s1 + $0x28] sm:$0xff] }
 0xbd9   :  { %v2656_v22 = vpop.f32.mrf.mxu1 }
 0xbda   :  { %2911 = vtanh.f32 %v1175_v17  ;;  %v2327_v58 = vmul.f32 -1.442695, %v1175_v17 }
 0xbdb   :  { %2913 = vpow2.f32 %v2325_v18 }
 0xbdc   :  { %2915 = vpow2.f32 %v2327_v58 }
 0xbe3   :  { %v2910_v15 = vpop.eup %2909 }
 0xbe4   :  { %1055 = vrot.lane.b32.xlu0 %v2910_v15, %s3111_s23  ;;  %v3740_v15 = vld [vmem:[%s4137_s1 + $0x20] sm:$0xff] }
 0xbe7   :  { %v2912_v16 = vpop.eup %2911 }
 0xbe8   :  { %1187 = vrot.lane.b32.xlu1 %v2912_v16, %s3111_s23  ;;  %v2914_v19 = vpop.eup %2913  ;;  %v3749_v16 = vld [vmem:[%s4137_s1 + $0x18] sm:$0xff] }
 0xbe9   :  { %v1049_v20 = vadd.f32 1.0, %v2914_v19  ;;  %v2916_v60 = vpop.eup %2915  ;;  %v3792_v19 = vld [vmem:[#allocation2] ss:$0 sm:$0xff] }
 0xbea   :  { %v1181_v21 = vadd.f32 1.0, %v2916_v60 }
 0xbeb   :  { %2917 = vrcp.f32 %v1049_v20 }
 0xbec   :  { %2919 = vrcp.f32 %v1181_v21 }
 0xbf8   :  { %v2918_v23 = vpop.eup %2917 }
 0xbf9   :  { %v2920_v27 = vpop.eup %2919  ;;  %v1053_v32 = vmul.f32 %v2918_v23, %v3596_v26 }
 0xbfa   :  { %v1185_v34 = vmul.f32 %v2920_v27, %v3600_v29  ;;  %v1309_v29 = vld [vmem:[%s4136_s0 + $0xd] sm:$0x1] }
 0xbfb   :  { %v1324_v42 = vrot.slane %v1309_v29, 7 }
 0xbfd   :  { %v1325_v55 = vsel %vm103_vm1, %v1324_v42, %v1308_v50 }
 0xbfe   :  { %v1327_v59 = vsel %vm106_vm2, %v1326_v54, %v1325_v55  ;;  %v1546_v55 = vld [vmem:[%s4136_s0 + $0x6] sm:$0x1] }
 0xbff   :  { %v1329_v63 = vsel %vm109_vm3, %v1328_v57, %v1327_v59  ;;  %v1564_v57 = vrot.slane %v1548_v53, 6 }
 0xc00   :  { %v1331_v6 = vsel %vm112_vm4, %v1330_v62, %v1329_v63  ;;  %v1566_v62 = vrot.slane %v1549_v56, 5 }
 0xc01   :  { %v1333_v8 = vsel %vm115_vm5, %v1332_v5, %v1331_v6  ;;  %v1568_v5 = vrot.slane %v1550_v61, 4  ;;  %v1786_v61 = vld [vmem:[%s4136_s0 + $0x17] sm:$0x1] }
 0xc02   :  { %v1335_v12 = vsel %vm118_vm6, %v1334_v7, %v1333_v8  ;;  %v1570_v7 = vrot.slane %v1551_v4, 3  ;;  %v1787_v4 = vld [vmem:[%s4136_s0 + $0x1f] sm:$0x1] }
 0xc03   :  { %v1337_v3 = vsel %vm121_vm7, %v1336_v9, %v1335_v12  ;;  %v1553_v9 = vld [vmem:[%s4136_s0 + $0x3e] sm:$0x1]  ;;  %v1572_v12 = vrot.slane %v1552_v43, 2  ;;  %v1788_v43 = vld [vmem:[%s4136_s0 + $0x27] sm:$0x1] }
 0xc56   :  { %v1056_v30 = vpop.permute.xlu0 %1055 }
 0xc57   :  { %v1058_v25 = vmul.f32 %v2918_v23, %v1056_v30 }
 0xc59   :  { %1060 = vrot.lane.b32.xlu0 %v1058_v25, %s3112_s24 }
 0xc5a   :  { %v1188_v28 = vpop.permute.xlu1 %1187 }
 0xc5b   :  { %v1190_v31 = vmul.f32 %v2920_v27, %v1188_v28 }
 0xc5d   :  { %1192 = vrot.lane.b32.xlu1 %v1190_v31, %s3112_s24 }
 0xccb   :  { %v1061_v33 = vpop.permute.xlu0 %1060 }
 0xccc   :  { %v3682_v11 = vadd.f32 %v1061_v33, %v1053_v32 }
 0xcce   :  { %2921 = vtanh.f32 %v3682_v11 }
 0xccf   :  { %v1193_v35 = vpop.permute.xlu1 %1192 }
 0xcd0   :  { %v3686_v14 = vadd.f32 %v1193_v35, %v1185_v34 }
 0xcd2   :  { %2923 = vtanh.f32 %v3686_v14 }
 0xcdb   :  { %v2922_v36 = vpop.eup %2921 }
 0xcdc   :  { %1066 = vrot.lane.b32.xlu0 %v2922_v36, %s3111_s23 }
 0xcdf   :  { %v2924_v37 = vpop.eup %2923 }
 0xce0   :  { %1198 = vrot.lane.b32.xlu1 %v2924_v37, %s3111_s23 }
 0xd4e   :  { %v1067_v38 = vpop.permute.xlu0 %1066 }
 0xd4f   :  { %v1069_v26 = vmul.f32 %v2918_v23, %v1067_v38 }
 0xd51   :  { %1207 = vrot.lane.b32.xlu1 %v1069_v26, %s3111_s23 }
 0xd52   :  { %v1199_v39 = vpop.permute.xlu1 %1198 }
 0xd53   :  { %v1201_v40 = vmul.f32 %v2920_v27, %v1199_v39 }
 0xd55   :  { %1203 = vrot.lane.b32.xlu0 %v1201_v40, %s3112_s24 }
 0xd59   :  { %1339 = vrot.lane.b32.xlu0 %v1201_v40, %s3113_s6 }
 0xdc3   :  { %v1208_v13 = vpop.permute.xlu1 %1207 }
 0xdc7   :  { %v1204_v1 = vpop.permute.xlu0 %1203 }
 0xdc8   :  { %v1210_v2 = vsel %vm241_vm10, %v1204_v1, %v1208_v13  ;;  %v1574_v1 = vrot.slane %v1553_v9, 1  ;;  %v1789_v9 = vld [vmem:[%s4136_s0 + $0x2f] sm:$0x1] }
 0xdc9   :  { %2674 = vmatmul.mubr.msk.f32.vlgmr.msra.gmra.mxu1 %vm258_vm11, %v1210_v2 }
 0xdca   :  { %2711 = vmatpush3.msra.mxu1 %v3730_v10  ;;  %2722 = vmatprep.mubr.msk.f32.mxu1 %vm3110_vm0, %v3109_v0 }
 0xdcb   :  { %v1340_v17 = vpop.permute.xlu0 %1339  ;;  %2712 = vmatprep.subr.mxu1 %v3109_v0 }
 0xdcc   :  { %v1342_v22 = vsel %vm124_vm8, %v1337_v3, %v1340_v17  ;;  %2713 = vmatpush3.msra.mxu1 %v3740_v15 }
 0xdcd   :  { %2689 = vmatmul.mubr.msk.f32.vlgmr.msra.gmra.mxu0 %vm139_vm9, %v1342_v22  ;;  %2714 = vmatprep.subr.mxu1 %v3109_v0 }
 0xdce   :  { %2692 = vmatpush3.msra.mxu0 %v3293_v44  ;;  %2715 = vmatpush3.msra.mxu1 %v3749_v16  ;;  %v3761_v44 = vld [vmem:[%s4137_s1 + $0x10] sm:$0xff] }
 0xdcf   :  { %2693 = vmatprep.subr.mxu0 %v3109_v0  ;;  %2716 = vmatprep.subr.mxu1 %v3109_v0 }
 0xdd0   :  { %2694 = vmatpush3.msra.mxu0 %v3298_v45  ;;  %2707 = vmatprep.mubr.msk.f32.mxu0 %vm3110_vm0, %v3109_v0  ;;  %v3770_v45 = vld [vmem:[%s4137_s1 + $0x8] sm:$0xff] }
 0xdd1   :  { %2695 = vmatprep.subr.mxu0 %v3109_v0  ;;  %2717 = vmatpush3.msra.mxu1 %v3761_v44 }
 0xdd2   :  { %2696 = vmatpush3.msra.mxu0 %v3305_v46  ;;  %2718 = vmatprep.subr.mxu1 %v3109_v0  ;;  %v3779_v46 = vld [vmem:[%s4137_s1] sm:$0xff] }
 0xdd3   :  { %2697 = vmatprep.subr.mxu0 %v3109_v0  ;;  %2719 = vmatpush3.msra.mxu1 %v3770_v45 }
 0xdd4   :  { %2698 = vmatpush3.msra.mxu0 %v3312_v47  ;;  %2720 = vmatprep.subr.mxu1 %v3109_v0 }
 0xdd5   :  { %2699 = vmatprep.subr.mxu0 %v3109_v0  ;;  %2721 = vmatpush3.msra.mxu1 %v3779_v46 }
 0xdd6   :  { %2700 = vmatpush3.msra.mxu0 %v3319_v48  ;;  %2725 = vmatprep.subr.mxu1 %v3109_v0 }
 0xdd7   :  { %2701 = vmatprep.subr.mxu0 %v3109_v0 }
 0xdd8   :  { %2702 = vmatpush3.msra.mxu0 %v3326_v49 }
 0xdd9   :  { %2703 = vmatprep.subr.mxu0 %v3109_v0 }
 0xdda   :  { %2704 = vmatpush3.msra.mxu0 %v3333_v51 }
 0xddb   :  { %2705 = vmatprep.subr.mxu0 %v3109_v0 }
 0xddc   :  { %2706 = vmatpush3.msra.mxu0 %v3343_v52 }
 0xddd   :  { %2744 = vmatprep.subr.mxu0 %v3109_v0 }
 0xe89   :  { %v1280_v47 = vpop.f32.mrf.mxu1 }
 0xe8a   :  { %v1281_v18 = vadd.f32 %v3416_v24, %v1280_v47 }
 0xe8b   :  { %v2675_v48 = vpop.f32.mrf.mxu1 }
 0xe8c   :  { %2925 = vtanh.f32 %v1281_v18  ;;  %v2329_v52 = vmul.f32 -1.442695, %v1281_v18 }
 0xe8d   :  { %v1412_v58 = vpop.f32.mrf.mxu0 }
 0xe8e   :  { %v1413_v49 = vadd.f32 %v3792_v19, %v1412_v58  ;;  %v3856_v58 = vld [vmem:[%s4139_s3 + $0x38] sm:$0xff] }
 0xe8f   :  { %v2690_v20 = vpop.f32.mrf.mxu0 }
 0xe90   :  { %2927 = vtanh.f32 %v1413_v49  ;;  %v2331_v21 = vmul.f32 -1.442695, %v1413_v49  ;;  %v3915_v49 = vld [vmem:[%s4139_s3] sm:$0xff] }
 0xe91   :  { %2929 = vpow2.f32 %v2329_v52 }
 0xe92   :  { %2931 = vpow2.f32 %v2331_v21 }
 0xe99   :  { %v2926_v60 = vpop.eup %2925 }
 0xe9a   :  { %1293 = vrot.lane.b32.xlu1 %v2926_v60, %s3111_s23  ;;  %v3919_v60 = vld [vmem:[#allocation5] ss:$0 sm:$0xff] }
 0xe9d   :  { %v2928_v51 = vpop.eup %2927 }
 0xe9e   :  { %1425 = vrot.lane.b32.xlu0 %v2928_v51, %s3111_s23  ;;  %v2930_v24 = vpop.eup %2929 }
 0xe9f   :  { %v1287_v23 = vadd.f32 1.0, %v2930_v24  ;;  %v2932_v30 = vpop.eup %2931 }
 0xea0   :  { %v1419_v25 = vadd.f32 1.0, %v2932_v30 }
 0xea1   :  { %2933 = vrcp.f32 %v1287_v23 }
 0xea2   :  { %2935 = vrcp.f32 %v1419_v25 }
 0xeae   :  { %v2934_v27 = vpop.eup %2933 }
 0xeaf   :  { %v2936_v32 = vpop.eup %2935  ;;  %v1291_v35 = vmul.f32 %v2934_v27, %v3682_v11 }
 0xeb0   :  { %v1423_v38 = vmul.f32 %v2936_v32, %v3686_v14  ;;  %v1547_v14 = vld [vmem:[%s4136_s0 + $0xe] sm:$0x1] }
 0xeb1   :  { %v1562_v54 = vrot.slane %v1547_v14, 7 }
 0xeb3   :  { %v1563_v59 = vsel %vm103_vm1, %v1562_v54, %v1546_v55 }
 0xeb4   :  { %v1565_v63 = vsel %vm106_vm2, %v1564_v57, %v1563_v59 }
 0xeb5   :  { %v1567_v6 = vsel %vm109_vm3, %v1566_v62, %v1565_v63  ;;  %v1784_v63 = vld [vmem:[%s4136_s0 + $0x7] sm:$0x1] }
 0xeb6   :  { %v1569_v8 = vsel %vm112_vm4, %v1568_v5, %v1567_v6  ;;  %v1802_v5 = vrot.slane %v1786_v61, 6 }
 0xeb7   :  { %v1571_v13 = vsel %vm115_vm5, %v1570_v7, %v1569_v8  ;;  %v1804_v7 = vrot.slane %v1787_v4, 5 }
 0xeb8   :  { %v1573_v2 = vsel %vm118_vm6, %v1572_v12, %v1571_v13  ;;  %v1806_v12 = vrot.slane %v1788_v43, 4 }
 0xeb9   :  { %v1575_v47 = vsel %vm121_vm7, %v1574_v1, %v1573_v2  ;;  %v1790_v1 = vld [vmem:[%s4136_s0 + $0x37] sm:$0x1]  ;;  %v1808_v2 = vrot.slane %v1789_v9, 3 }
 0xf0c   :  { %v1294_v28 = vpop.permute.xlu1 %1293 }
 0xf0d   :  { %v1296_v31 = vmul.f32 %v2934_v27, %v1294_v28 }
 0xf0f   :  { %1298 = vrot.lane.b32.xlu1 %v1296_v31, %s3112_s24 }
 0xf10   :  { %v1426_v33 = vpop.permute.xlu0 %1425 }
 0xf11   :  { %v1428_v34 = vmul.f32 %v2936_v32, %v1426_v33 }
 0xf13   :  { %1430 = vrot.lane.b32.xlu0 %v1428_v34, %s3112_s24 }
 0xf81   :  { %v1299_v36 = vpop.permute.xlu1 %1298 }
 0xf82   :  { %v3800_v37 = vadd.f32 %v1299_v36, %v1291_v35 }
 0xf84   :  { %2937 = vtanh.f32 %v3800_v37 }
 0xf85   :  { %v1431_v26 = vpop.permute.xlu0 %1430 }
 0xf86   :  { %v3804_v39 = vadd.f32 %v1431_v26, %v1423_v38 }
 0xf88   :  { %2939 = vtanh.f32 %v3804_v39 }
 0xf91   :  { %v2938_v40 = vpop.eup %2937 }
 0xf92   :  { %1304 = vrot.lane.b32.xlu1 %v2938_v40, %s3111_s23 }
 0xf95   :  { %v2940_v29 = vpop.eup %2939 }
 0xf96   :  { %1436 = vrot.lane.b32.xlu0 %v2940_v29, %s3111_s23 }
0x1004   :  { %v1305_v41 = vpop.permute.xlu1 %1304 }
0x1005   :  { %v1307_v11 = vmul.f32 %v2934_v27, %v1305_v41 }
0x1007   :  { %1445 = vrot.lane.b32.xlu0 %v1307_v11, %s3111_s23 }
0x1008   :  { %v1437_v42 = vpop.permute.xlu0 %1436 }
0x1009   :  { %v1439_v50 = vmul.f32 %v2936_v32, %v1437_v42 }
0x100b   :  { %1441 = vrot.lane.b32.xlu1 %v1439_v50, %s3112_s24 }
0x100f   :  { %1577 = vrot.lane.b32.xlu1 %v1439_v50, %s3113_s6 }
0x1079   :  { %v1446_v3 = vpop.permute.xlu0 %1445 }
0x107d   :  { %v1442_v17 = vpop.permute.xlu1 %1441 }
0x107e   :  { %v1448_v22 = vsel %vm241_vm10, %v1442_v17, %v1446_v3  ;;  %v1791_v17 = vld [vmem:[%s4136_s0 + $0x3f] sm:$0x1] }
0x107f   :  { %2708 = vmatmul.mubr.msk.f32.vlgmr.msra.gmra.mxu0 %vm258_vm11, %v1448_v22  ;;  %v1810_v22 = vrot.slane %v1790_v1, 2  ;;  %v2024_v1 = vld [vmem:[%s4141_s5 + $0x10] sm:$0xff] }
0x1080   :  { %2745 = vmatpush3.msra.mxu0 %v3730_v10  ;;  %2756 = vmatprep.mubr.msk.f32.mxu0 %vm3110_vm0, %v3109_v0  ;;  %v3865_v10 = vld [vmem:[%s4139_s3 + $0x30] sm:$0xff] }
0x1081   :  { %v1578_v18 = vpop.permute.xlu1 %1577  ;;  %2746 = vmatprep.subr.mxu0 %v3109_v0 }
0x1082   :  { %v1580_v48 = vsel %vm124_vm8, %v1575_v47, %v1578_v18  ;;  %2747 = vmatpush3.msra.mxu0 %v3740_v15  ;;  %v3875_v15 = vld [vmem:[%s4139_s3 + $0x28] sm:$0xff]  ;;  %v1812_v18 = vrot.slane %v1791_v17, 1 }
0x1083   :  { %2723 = vmatmul.mubr.msk.f32.vlgmr.msra.gmra.mxu1 %vm139_vm9, %v1580_v48  ;;  %2748 = vmatprep.subr.mxu0 %v3109_v0 }
0x1084   :  { %2726 = vmatpush3.msra.mxu1 %v3856_v58  ;;  %2749 = vmatpush3.msra.mxu0 %v3749_v16  ;;  %v3884_v16 = vld [vmem:[%s4139_s3 + $0x20] sm:$0xff] }
0x1085   :  { %2727 = vmatprep.subr.mxu1 %v3109_v0  ;;  %2750 = vmatprep.subr.mxu0 %v3109_v0 }
0x1086   :  { %2728 = vmatpush3.msra.mxu1 %v3865_v10  ;;  %2741 = vmatprep.mubr.msk.f32.mxu1 %vm3110_vm0, %v3109_v0 }
0x1087   :  { %2729 = vmatprep.subr.mxu1 %v3109_v0  ;;  %2751 = vmatpush3.msra.mxu0 %v3761_v44  ;;  %v3893_v44 = vld [vmem:[%s4139_s3 + $0x18] sm:$0xff] }
0x1088   :  { %2730 = vmatpush3.msra.mxu1 %v3875_v15  ;;  %2752 = vmatprep.subr.mxu0 %v3109_v0 }
0x1089   :  { %2731 = vmatprep.subr.mxu1 %v3109_v0  ;;  %2753 = vmatpush3.msra.mxu0 %v3770_v45  ;;  %v3901_v45 = vld [vmem:[%s4139_s3 + $0x10] sm:$0xff] }
0x108a   :  { %2732 = vmatpush3.msra.mxu1 %v3884_v16  ;;  %2754 = vmatprep.subr.mxu0 %v3109_v0 }
0x108b   :  { %2733 = vmatprep.subr.mxu1 %v3109_v0  ;;  %2755 = vmatpush3.msra.mxu0 %v3779_v46  ;;  %v3908_v46 = vld [vmem:[%s4139_s3 + $0x8] sm:$0xff] }
0x108c   :  { %2734 = vmatpush3.msra.mxu1 %v3893_v44  ;;  %2759 = vmatprep.subr.mxu0 %v3109_v0 }
0x108d   :  { %2735 = vmatprep.subr.mxu1 %v3109_v0 }
0x108e   :  { %2736 = vmatpush3.msra.mxu1 %v3901_v45 }
0x108f   :  { %2737 = vmatprep.subr.mxu1 %v3109_v0 }
0x1090   :  { %2738 = vmatpush3.msra.mxu1 %v3908_v46 }
0x1091   :  { %2739 = vmatprep.subr.mxu1 %v3109_v0 }
0x1092   :  { %2740 = vmatpush3.msra.mxu1 %v3915_v49 }
0x1093   :  { %2778 = vmatprep.subr.mxu1 %v3109_v0 }
0x113f   :  { %v1518_v20 = vpop.f32.mrf.mxu0 }
0x1140   :  { %v1519_v51 = vadd.f32 %v3919_v60, %v1518_v20 }
0x1141   :  { %v2709_v52 = vpop.f32.mrf.mxu0 }
0x1142   :  { %2941 = vtanh.f32 %v1519_v51  ;;  %v2333_v27 = vmul.f32 -1.442695, %v1519_v51 }
0x1143   :  { %v1650_v21 = vpop.f32.mrf.mxu1 }
0x1144   :  { %v1651_v24 = vadd.f32 %v3792_v19, %v1650_v21 }
0x1145   :  { %v2724_v23 = vpop.f32.mrf.mxu1 }
0x1146   :  { %2943 = vtanh.f32 %v1651_v24  ;;  %v2335_v28 = vmul.f32 -1.442695, %v1651_v24 }
0x1147   :  { %2945 = vpow2.f32 %v2333_v27 }
0x1148   :  { %2947 = vpow2.f32 %v2335_v28 }
0x114f   :  { %v2942_v30 = vpop.eup %2941 }
0x1150   :  { %1531 = vrot.lane.b32.xlu0 %v2942_v30, %s3111_s23 }
0x1153   :  { %v2944_v25 = vpop.eup %2943 }
0x1154   :  { %1663 = vrot.lane.b32.xlu1 %v2944_v25, %s3111_s23  ;;  %v2946_v31 = vpop.eup %2945 }
0x1155   :  { %v1525_v32 = vadd.f32 1.0, %v2946_v31  ;;  %v2948_v33 = vpop.eup %2947 }
0x1156   :  { %v1657_v34 = vadd.f32 1.0, %v2948_v33 }
0x1157   :  { %2949 = vrcp.f32 %v1525_v32 }
0x1158   :  { %2951 = vrcp.f32 %v1657_v34 }
0x1164   :  { %v2950_v35 = vpop.eup %2949 }
0x1165   :  { %v2952_v26 = vpop.eup %2951  ;;  %v1529_v41 = vmul.f32 %v2950_v35, %v3800_v37 }
0x1166   :  { %v1661_v50 = vmul.f32 %v2952_v26, %v3804_v39  ;;  %v1785_v39 = vld [vmem:[%s4136_s0 + $0xf] sm:$0x1] }
0x1167   :  { %v1800_v62 = vrot.slane %v1785_v39, 7 }
0x1169   :  { %v1801_v6 = vsel %vm103_vm1, %v1800_v62, %v1784_v63 }
0x116a   :  { %v1803_v8 = vsel %vm106_vm2, %v1802_v5, %v1801_v6 }
0x116b   :  { %v1805_v13 = vsel %vm109_vm3, %v1804_v7, %v1803_v8 }
0x116c   :  { %v1807_v3 = vsel %vm112_vm4, %v1806_v12, %v1805_v13 }
0x116d   :  { %v1809_v47 = vsel %vm115_vm5, %v1808_v2, %v1807_v3  ;;  %v2023_v2 = vld [vmem:[%s4141_s5 + $0x8] sm:$0xff]  ;;  %v2022_v3 = vld [vmem:[%s4141_s5] sm:$0xff] }
0x116e   :  { %v1811_v48 = vsel %vm118_vm6, %v1810_v22, %v1809_v47 }
0x116f   :  { %v1813_v21 = vsel %vm121_vm7, %v1812_v18, %v1811_v48  ;;  %v2123_v18 = vld [vmem:[%s4143_s7 + $0x78] sm:$0xff] }
0x11c2   :  { %v1532_v36 = vpop.permute.xlu0 %1531 }
0x11c3   :  { %v1534_v38 = vmul.f32 %v2950_v35, %v1532_v36 }
0x11c5   :  { %1536 = vrot.lane.b32.xlu0 %v1534_v38, %s3112_s24 }
0x11c6   :  { %v1664_v40 = vpop.permute.xlu1 %1663 }
0x11c7   :  { %v1666_v29 = vmul.f32 %v2952_v26, %v1664_v40 }
0x11c9   :  { %1668 = vrot.lane.b32.xlu1 %v1666_v29, %s3112_s24 }
0x1237   :  { %v1537_v11 = vpop.permute.xlu0 %1536 }
0x1238   :  { %v3928_v42 = vadd.f32 %v1537_v11, %v1529_v41 }
0x123a   :  { %2953 = vtanh.f32 %v3928_v42 }
0x123b   :  { %v1669_v14 = vpop.permute.xlu1 %1668 }
0x123c   :  { %v3932_v53 = vadd.f32 %v1669_v14, %v1661_v50 }
0x123e   :  { %2955 = vtanh.f32 %v3932_v53 }
0x1247   :  { %v2954_v54 = vpop.eup %2953 }
0x1248   :  { %1542 = vrot.lane.b32.xlu0 %v2954_v54, %s3111_s23 }
0x124b   :  { %v2956_v55 = vpop.eup %2955 }
0x124c   :  { %1674 = vrot.lane.b32.xlu1 %v2956_v55, %s3111_s23 }
0x12ba   :  { %v1543_v56 = vpop.permute.xlu0 %1542 }
0x12bb   :  { %v1545_v37 = vmul.f32 %v2950_v35, %v1543_v56 }
0x12bd   :  { %1683 = vrot.lane.b32.xlu1 %v1545_v37, %s3111_s23 }
0x12be   :  { %v1675_v57 = vpop.permute.xlu1 %1674 }
0x12bf   :  { %v1677_v59 = vmul.f32 %v2952_v26, %v1675_v57 }
0x12c1   :  { %1679 = vrot.lane.b32.xlu0 %v1677_v59, %s3112_s24 }
0x12c5   :  { %1815 = vrot.lane.b32.xlu0 %v1677_v59, %s3113_s6 }
0x132f   :  { %v1684_v20 = vpop.permute.xlu1 %1683 }
0x1333   :  { %v1680_v51 = vpop.permute.xlu0 %1679 }
0x1334   :  { %v1686_v52 = vsel %vm241_vm10, %v1680_v51, %v1684_v20  ;;  %v2122_v20 = vld [vmem:[%s4143_s7 + $0x70] sm:$0xff]  ;;  %v2121_v51 = vld [vmem:[%s4143_s7 + $0x68] sm:$0xff] }
0x1335   :  { %2742 = vmatmul.mubr.msk.f32.vlgmr.msra.gmra.mxu1 %vm258_vm11, %v1686_v52  ;;  %v2120_v52 = vld [vmem:[%s4143_s7 + $0x60] sm:$0xff] }
0x1336   :  { %2786 = vmatprep.mubr.msk.f32.mxu1 %vm3110_vm0, %v3109_v0 }
0x1337   :  { %v1816_v24 = vpop.permute.xlu0 %1815 }
0x1338   :  { %v1818_v23 = vsel %vm124_vm8, %v1813_v21, %v1816_v24  ;;  %v2119_v21 = vld [vmem:[%s4143_s7 + $0x58] sm:$0xff]  ;;  %v2118_v24 = vld [vmem:[%s4143_s7 + $0x50] sm:$0xff] }
0x1339   :  { %2757 = vmatmul.mubr.msk.f32.vlgmr.msra.gmra.mxu0 %vm139_vm9, %v1818_v23  ;;  %v2117_v23 = vld [vmem:[%s4143_s7 + $0x48] sm:$0xff] }
0x133a   :  { %2760 = vmatpush3.msra.mxu0 %v3856_v58  ;;  %2775 = vmatprep.mubr.msk.f32.mxu0 %vm3110_vm0, %v3109_v0 }
0x133b   :  { %2761 = vmatprep.subr.mxu0 %v3109_v0 }
0x133c   :  { %2762 = vmatpush3.msra.mxu0 %v3865_v10 }
0x133d   :  { %2763 = vmatprep.subr.mxu0 %v3109_v0 }
0x133e   :  { %2764 = vmatpush3.msra.mxu0 %v3875_v15 }
0x133f   :  { %2765 = vmatprep.subr.mxu0 %v3109_v0 }
0x1340   :  { %2766 = vmatpush3.msra.mxu0 %v3884_v16 }
0x1341   :  { %2767 = vmatprep.subr.mxu0 %v3109_v0 }
0x1342   :  { %2768 = vmatpush3.msra.mxu0 %v3893_v44 }
0x1343   :  { %2769 = vmatprep.subr.mxu0 %v3109_v0 }
0x1344   :  { %2770 = vmatpush3.msra.mxu0 %v3901_v45 }
0x1345   :  { %2771 = vmatprep.subr.mxu0 %v3109_v0 }
0x1346   :  { %2772 = vmatpush3.msra.mxu0 %v3908_v46 }
0x1347   :  { %2773 = vmatprep.subr.mxu0 %v3109_v0 }
0x1348   :  { %2774 = vmatpush3.msra.mxu0 %v3915_v49 }
0x1349   :  { %2824 = vmatprep.subr.mxu0 %v3109_v0 }
0x13f5   :  { %v1756_v58 = vpop.f32.mrf.mxu1 }
0x13f6   :  { %v1757_v10 = vadd.f32 %v3919_v60, %v1756_v58  ;;  %v2116_v58 = vld [vmem:[%s4143_s7 + $0x40] sm:$0xff] }
0x13f7   :  { %v2743_v15 = vpop.f32.mrf.mxu1 }
0x13f8   :  { %2957 = vtanh.f32 %v1757_v10  ;;  %v2337_v25 = vmul.f32 -1.442695, %v1757_v10  ;;  %v2115_v10 = vld [vmem:[%s4143_s7 + $0x38] sm:$0xff]  ;;  %v2114_v15 = vld [vmem:[%s4143_s7 + $0x30] sm:$0xff] }
0x13f9   :  { %v1888_v16 = vpop.f32.mrf.mxu0 }
0x13fa   :  { %v1889_v44 = vadd.f32 %v3792_v19, %v1888_v16  ;;  %v2113_v16 = vld [vmem:[%s4143_s7 + $0x28] sm:$0xff] }
0x13fb   :  { %v2758_v30 = vpop.f32.mrf.mxu0 }
0x13fc   :  { %2959 = vtanh.f32 %v1889_v44  ;;  %v2339_v49 = vmul.f32 -1.442695, %v1889_v44  ;;  %v2112_v44 = vld [vmem:[%s4143_s7 + $0x20] sm:$0xff]  ;;  %v2111_v30 = vld [vmem:[%s4143_s7 + $0x18] sm:$0xff] }
0x13fd   :  { %2961 = vpow2.f32 %v2337_v25  ;;  %v2108_v25 = vld [vmem:[%s4143_s7] sm:$0xff] }
0x13fe   :  { %2963 = vpow2.f32 %v2339_v49  ;;  %v2208_v49 = vld [vmem:[%s4145_s9 + $0x38] sm:$0xff] }
0x1405   :  { %v2958_v45 = vpop.eup %2957 }
0x1406   :  { %1769 = vrot.lane.b32.xlu1 %v2958_v45, %s3111_s23  ;;  %v2110_v45 = vld [vmem:[%s4143_s7 + $0x10] sm:$0xff] }
0x1409   :  { %v2960_v46 = vpop.eup %2959 }
0x140a   :  { %1901 = vrot.lane.b32.xlu0 %v2960_v46, %s3111_s23  ;;  %v2962_v27 = vpop.eup %2961  ;;  %v2109_v46 = vld [vmem:[%s4143_s7 + $0x8] sm:$0xff] }
0x140b   :  { %v1763_v28 = vadd.f32 1.0, %v2962_v27  ;;  %v2964_v31 = vpop.eup %2963  ;;  %v2207_v27 = vld [vmem:[%s4145_s9 + $0x30] sm:$0xff] }
0x140c   :  { %v1895_v32 = vadd.f32 1.0, %v2964_v31  ;;  %v2205_v31 = vld [vmem:[%s4145_s9 + $0x20] sm:$0xff] }
0x140d   :  { %2965 = vrcp.f32 %v1763_v28  ;;  %v2206_v28 = vld [vmem:[%s4145_s9 + $0x28] sm:$0xff] }
0x140e   :  { %2967 = vrcp.f32 %v1895_v32  ;;  %v2204_v32 = vld [vmem:[%s4145_s9 + $0x18] sm:$0xff] }
0x141a   :  { %v2966_v33 = vpop.eup %2965 }
0x141b   :  { %v2968_v35 = vpop.eup %2967  ;;  %v1767_v26 = vmul.f32 %v2966_v33, %v3928_v42 }
0x141c   :  { %v1899_v41 = vmul.f32 %v2968_v35, %v3932_v53 }
0x1478   :  { %v1770_v19 = vpop.permute.xlu1 %1769 }
0x1479   :  { %v1772_v34 = vmul.f32 %v2966_v33, %v1770_v19  ;;  %v2342_v19 = vld [vmem:[#allocation7] ss:$0 sm:$0xff] }
0x147b   :  { %1774 = vrot.lane.b32.xlu1 %v1772_v34, %s3112_s24 }
0x147c   :  { %v1902_v36 = vpop.permute.xlu0 %1901 }
0x147d   :  { %v1904_v38 = vmul.f32 %v2968_v35, %v1902_v36 }
0x147f   :  { %1906 = vrot.lane.b32.xlu0 %v1904_v38, %s3112_s24  ;;  %v2202_v38 = vld [vmem:[%s4145_s9 + $0x8] sm:$0xff] }
0x14ed   :  { %v1775_v40 = vpop.permute.xlu1 %1774 }
0x14ee   :  { %v1777_v29 = vadd.f32 %v1775_v40, %v1767_v26  ;;  %v2201_v26 = vld [vmem:[%s4145_s9] sm:$0xff] }
0x14ef   :  { %v2344_v40 = vld [vmem:[#allocation8] ss:$0 sm:$0xff] }
0x14f0   :  { %2969 = vtanh.f32 %v1777_v29 }
0x14f1   :  { %v1907_v11 = vpop.permute.xlu0 %1906 }
0x14f2   :  { %v1909_v50 = vadd.f32 %v1907_v11, %v1899_v41 }
0x14f4   :  { %2971 = vtanh.f32 %v1909_v50  ;;  %v2345_v50 = vld [vmem:[%s4146_s10] ss:$0 sm:$0xff] }
0x14fd   :  { %v2970_v14 = vpop.eup %2969 }
0x14fe   :  { %1780 = vrot.lane.b32.xlu1 %v2970_v14, %s3111_s23 }
0x1501   :  { %v2972_v54 = vpop.eup %2971 }
0x1502   :  { %1912 = vrot.lane.b32.xlu0 %v2972_v54, %s3111_s23 }
0x1570   :  { %v1781_v55 = vpop.permute.xlu1 %1780 }
0x1571   :  { %v1783_v56 = vmul.f32 %v2966_v33, %v1781_v55  ;;  %v2203_v33 = vld [vmem:[%s4145_s9 + $0x10] sm:$0xff]  ;;  %s3077_s9 = scalar_lea.vmem %s2298_s18, 128 }
0x1572   :  { %p3078_p6 = scmp.ne.s32.totalorder %s2298_s18, %s3077_s9  ;;  %p3083_p8 = scmp.lt.s32.totalorder %s3077_s9, %s3077_s9 }
0x1573   :  { %1921 = vrot.lane.b32.xlu0 %v1783_v56, %s3111_s23 }
0x1574   :  { %v1913_v37 = vpop.permute.xlu0 %1912  ;;  %p3084_p9 = por %p3083_p8, %p3082_p7 }
0x1575   :  { %v1915_v42 = vmul.f32 %v2968_v35, %v1913_v37 }
0x1576   :  { %p3085_p10 = pnand %p3084_p9, %p3078_p6 }
0x1577   :  { %1917 = vrot.lane.b32.xlu1 %v1915_v42, %s3112_s24 }
0x15e5   :  { %v1922_v57 = vpop.permute.xlu0 %1921 }
0x15e9   :  { %v1918_v59 = vpop.permute.xlu1 %1917 }
0x15ea   :  { %v1924_v53 = vsel %vm241_vm10, %v1918_v59, %v1922_v57 }
0x15eb   :  { %2776 = vmatmul.mubr.msk.f32.vlgmr.msra.gmra.mxu0 %vm258_vm11, %v1924_v53 }
0x15ec   :  { %2840 = vmatprep.mubr.msk.f32.mxu0 %vm3110_vm0, %v3109_v0  ;;  %2825 = vmatpush3.msra.mxu0 %v2208_v49 }
0x15ed   :  { %2826 = vmatprep.subr.mxu0 %v3109_v0 }
0x15ee   :  { %2827 = vmatpush3.msra.mxu0 %v2207_v27 }
0x15ef   :  { %2828 = vmatprep.subr.mxu0 %v3109_v0 }
0x15f0   :  { %2829 = vmatpush3.msra.mxu0 %v2206_v28 }
0x15f1   :  { %2830 = vmatprep.subr.mxu0 %v3109_v0 }
0x15f2   :  { %2831 = vmatpush3.msra.mxu0 %v2205_v31 }
0x15f3   :  { %2832 = vmatprep.subr.mxu0 %v3109_v0 }
0x15f4   :  { %2833 = vmatpush3.msra.mxu0 %v2204_v32 }
0x15f5   :  { %2834 = vmatprep.subr.mxu0 %v3109_v0 }
0x15f6   :  { %2835 = vmatpush3.msra.mxu0 %v2203_v33 }
0x15f7   :  { %2836 = vmatprep.subr.mxu0 %v3109_v0 }
0x15f8   :  { %2837 = vmatpush3.msra.mxu0 %v2202_v38 }
0x15f9   :  { %2838 = vmatprep.subr.mxu0 %v3109_v0 }
0x15fa   :  { %2839 = vmatpush3.msra.mxu0 %v2201_v26 }
0x16ab   :  { %v1994_v39 = vpop.f32.mrf.mxu0 }
0x16ac   :  { %v1995_v61 = vadd.f32 %v3919_v60, %v1994_v39  ;;  %v2025_v60 = vld [vmem:[%s4141_s5 + $0x18] sm:$0xff] }
0x16ad   :  { %v2777_v62 = vpop.f32.mrf.mxu0  ;;  %2779 = vmatpush3.msra.mxu1 %v2025_v60 }
0x16ae   :  { %2973 = vtanh.f32 %v1995_v61  ;;  %v2341_v4 = vmul.f32 -1.442695, %v1995_v61  ;;  %2780 = vmatprep.subr.mxu1 %v3109_v0 }
0x16af   :  { %2781 = vmatpush3.msra.mxu1 %v2024_v1 }
0x16b0   :  { %2975 = vpow2.f32 %v2341_v4  ;;  %2782 = vmatprep.subr.mxu1 %v3109_v0 }
0x16b1   :  { %2783 = vmatpush3.msra.mxu1 %v2023_v2 }
0x16b2   :  { %2784 = vmatprep.subr.mxu1 %v3109_v0 }
0x16b3   :  { %2785 = vmatpush3.msra.mxu1 %v2022_v3 }
0x16b4   :  { %2789 = vmatprep.subr.mxu1 %v3109_v0 }
0x16bb   :  { %v2974_v63 = vpop.eup %2973 }
0x16bc   :  { %2007 = vrot.lane.b32.xlu1 %v2974_v63, %s3111_s23 }
0x16bd   :  { %v2976_v5 = vpop.eup %2975 }
0x16be   :  { %v2001_v6 = vadd.f32 1.0, %v2976_v5 }
0x16c0   :  { %2977 = vrcp.f32 %v2001_v6 }
0x16cd   :  { %v2978_v43 = vpop.eup %2977 }
0x16ce   :  { %v2005_v9 = vmul.f32 %v2978_v43, %v1777_v29 }
0x172e   :  { %v2008_v7 = vpop.permute.xlu1 %2007 }
0x172f   :  { %v2010_v8 = vmul.f32 %v2978_v43, %v2008_v7 }
0x1731   :  { %2012 = vrot.lane.b32.xlu0 %v2010_v8, %s3112_s24 }
0x17a3   :  { %v2013_v12 = vpop.permute.xlu0 %2012 }
0x17a4   :  { %v2015_v13 = vadd.f32 %v2013_v12, %v2005_v9 }
0x17a6   :  { %2979 = vtanh.f32 %v2015_v13 }
0x17b3   :  { %v2980_v17 = vpop.eup %2979 }
0x17b4   :  { %2018 = vrot.lane.b32.xlu1 %v2980_v17, %s3111_s23 }
0x1826   :  { %v2019_v22 = vpop.permute.xlu1 %2018 }
0x1827   :  { %v2021_v47 = vmul.f32 %v2978_v43, %v2019_v22 }
0x1829   :  { %2034 = vrot.lane.b32.xlu0 %v2021_v47, %s3112_s24 }
0x189b   :  { %v2035_v48 = vpop.permute.xlu0 %2034 }
0x189c   :  { %2787 = vmatmul.mubr.msk.f32.vlgmr.msra.gmra.mxu1 %vm241_vm10, %v2035_v48 }
0x189d   :  { %2790 = vmatpush3.msra.mxu1 %v2123_v18  ;;  %2821 = vmatprep.mubr.msk.f32.mxu1 %vm3110_vm0, %v3109_v0 }
0x189e   :  { %2791 = vmatprep.subr.mxu1 %v3109_v0 }
0x189f   :  { %2792 = vmatpush3.msra.mxu1 %v2122_v20 }
0x18a0   :  { %2793 = vmatprep.subr.mxu1 %v3109_v0 }
0x18a1   :  { %2794 = vmatpush3.msra.mxu1 %v2121_v51 }
0x18a2   :  { %2795 = vmatprep.subr.mxu1 %v3109_v0 }
0x18a3   :  { %2796 = vmatpush3.msra.mxu1 %v2120_v52 }
0x18a4   :  { %2797 = vmatprep.subr.mxu1 %v3109_v0 }
0x18a5   :  { %2798 = vmatpush3.msra.mxu1 %v2119_v21 }
0x18a6   :  { %2799 = vmatprep.subr.mxu1 %v3109_v0 }
0x18a7   :  { %2800 = vmatpush3.msra.mxu1 %v2118_v24 }
0x18a8   :  { %2801 = vmatprep.subr.mxu1 %v3109_v0 }
0x18a9   :  { %2802 = vmatpush3.msra.mxu1 %v2117_v23 }
0x18aa   :  { %2803 = vmatprep.subr.mxu1 %v3109_v0 }
0x18ab   :  { %2804 = vmatpush3.msra.mxu1 %v2116_v58 }
0x18ac   :  { %2805 = vmatprep.subr.mxu1 %v3109_v0 }
0x18ad   :  { %2806 = vmatpush3.msra.mxu1 %v2115_v10 }
0x18ae   :  { %2807 = vmatprep.subr.mxu1 %v3109_v0 }
0x18af   :  { %2808 = vmatpush3.msra.mxu1 %v2114_v15 }
0x18b0   :  { %2809 = vmatprep.subr.mxu1 %v3109_v0 }
0x18b1   :  { %2810 = vmatpush3.msra.mxu1 %v2113_v16 }
0x18b2   :  { %2811 = vmatprep.subr.mxu1 %v3109_v0 }
0x18b3   :  { %2812 = vmatpush3.msra.mxu1 %v2112_v44 }
0x18b4   :  { %2813 = vmatprep.subr.mxu1 %v3109_v0 }
0x18b5   :  { %2814 = vmatpush3.msra.mxu1 %v2111_v30 }
0x18b6   :  { %2815 = vmatprep.subr.mxu1 %v3109_v0 }
0x18b7   :  { %2816 = vmatpush3.msra.mxu1 %v2110_v45 }
0x18b8   :  { %2817 = vmatprep.subr.mxu1 %v3109_v0 }
0x18b9   :  { %2818 = vmatpush3.msra.mxu1 %v2109_v46 }
0x18ba   :  { %2819 = vmatprep.subr.mxu1 %v3109_v0 }
0x18bb   :  { %2820 = vmatpush3.msra.mxu1 %v2108_v25 }
0x195c   :  { %v2104_v34 = vpop.f32.mrf.mxu1 }
0x195d   :  { %v2105_v35 = vadd.f32 %v2342_v19, %v2104_v34 }
0x195e   :  { %v2788_v36 = vpop.f32.mrf.mxu1 }
0x195f   :  { %2822 = vmatmul.mubr.f32.vlgmr.msra.gmra.mxu1 %v2105_v35 }
0x1a1f   :  { %v2197_v29 = vpop.f32.mrf.mxu1 }
0x1a20   :  { %v2198_v41 = vadd.f32 %v2344_v40, %v2197_v29 }
0x1a21   :  { %v2823_v11 = vpop.f32.mrf.mxu1 }
0x1a22   :  { %2841 = vmatmul.mubr.msk.f32.vlgmr.msra.gmra.mxu0 %vm258_vm11, %v2198_v41 }
0x1ae2   :  { %v2285_v14 = vpop.f32.mrf.mxu0 }
0x1ae3   :  { %v2286_v0 = vadd.f32 %v2345_v50, %v2285_v14 }
0x1ae4   :  { %v2842_v54 = vpop.f32.mrf.mxu0 }
0x1ae5   :  { %2290 = vst.msk [vmem:[#allocation10] sm:$0xff] %vm2289_vm12, %v2286_v0 }
0x1ae6   :  { %3088 = shalt.err (!%p3085_p10)
}
0x1ae7   :  { %2300 = dma.vmem_to_hbm [thread:$0]  %s2298_s18, 128, %s4147_s11, [#allocation4]  }
0x1ae8   :  { %3103 = dma.done.wait [#allocation4], 128  }
0x1ae9   :  { %3104 = vsyncadd [#allocation4], 4294967168 }
0x1aea   :  { %2304 = vsyncpa [#allocation3], 1 }
0x1aeb   :  { %2305 = vsyncpa [#allocation6], 1 }
0x1aec   :  { %2306 = vsyncpa [#allocation9], 1 }
0x1aed   :  { %2307 = vsyncpa [#allocation4], 1 }

</bundles_post_ra>
